<compile_context>
chip_gen: v6e
topology: v6e:2x2x1
jax: 0.10.0
libtpu: 0.0.40
codegen_flags: <defaults>
</compile_context>

<pallas_src>
import math

import jax
import jax.numpy as jnp
from jax.experimental import pallas as pl
from jax.experimental.pallas import tpu as pltpu

LANE = 128  # lane-dense output slab width


def _elu(x):
    # F.elu with alpha=1.0: x if x > 0 else exp(x) - 1  (f32 throughout)
    return jnp.where(x > 0, x, jnp.exp(x) - 1.0)


def transformer_kernel(x_ref,
                       w11_ref, b11_ref,
                       w12_ref, b12_ref,
                       wmid_ref, bmid_ref,      # fused fc13 @ fc21
                       w22_ref, b22_ref,
                       wout1_ref, wout2_ref, bout_ref,  # padded [64,128] output weights
                       out_ref):
    x = x_ref[...]

    # hoist bias loads once per tile
    b11 = b11_ref[...]
    b12 = b12_ref[...]
    bmid = bmid_ref[...]
    b22 = b22_ref[...]
    bout = bout_ref[...]

    # map524 hidden: in_dim -> 64 -> 64 (ELU on both)
    h = _elu(jnp.dot(x, w11_ref[...], preferred_element_type=jnp.float32) + b11)
    h = _elu(jnp.dot(h, w12_ref[...], preferred_element_type=jnp.float32) + b12)

    # map425 hidden, with fc13∘fc21 fused into one 64x64 layer (no nonlinearity
    # sits between them in the original module, so this is mathematically exact)
    g = _elu(jnp.dot(h, wmid_ref[...], preferred_element_type=jnp.float32) + bmid)
    g = _elu(jnp.dot(g, w22_ref[...], preferred_element_type=jnp.float32) + b22)

    # lane-dense output slab: cols [0:out_dim]            = x2z  = h @ w13 + b13
    #                         cols [out_dim:out_dim+a]    = AN   = h @ (w13@wA) + b13@wA
    #                         cols [out_dim+a:+in_dim]    = z2x  = g @ w23 + b23
    slab = (jnp.dot(h, wout1_ref[...], preferred_element_type=jnp.float32)
            + jnp.dot(g, wout2_ref[...], preferred_element_type=jnp.float32)
            + bout)
    out_ref[...] = slab  # full (TILE_M, 128) unmasked store


def init_params(key, in_dim, out_dim, A_dim):
    """Deterministic init mimicking nn.Linear's U(-1/sqrt(fan_in), 1/sqrt(fan_in))."""
    def linear(k, fan_in, fan_out, bias=True):
        kw, kb = jax.random.split(k)
        bound = 1.0 / math.sqrt(fan_in)
        w = jax.random.uniform(kw, (fan_in, fan_out), jnp.float32, -bound, bound)
        if not bias:
            return w, None
        b = jax.random.uniform(kb, (1, fan_out), jnp.float32, -bound, bound)
        return w, b

    keys = jax.random.split(key, 7)
    w11, b11 = linear(keys[0], in_dim, 64)
    w12, b12 = linear(keys[1], 64, 64)
    w13, b13 = linear(keys[2], 64, out_dim)
    w21, b21 = linear(keys[3], out_dim, 64)
    w22, b22 = linear(keys[4], 64, 64)
    w23, b23 = linear(keys[5], 64, in_dim)
    wA, _ = linear(keys[6], A_dim[0], A_dim[1], bias=False)
    return dict(w11=w11, b11=b11, w12=w12, b12=b12, w13=w13, b13=b13,
                w21=w21, b21=b21, w22=w22, b22=b22, w23=w23, b23=b23, wA=wA)


def _prepare_fused_params(p):
    """Constant-fold the linear compositions and pad the output weights to a
    single 128-lane slab. Done once in the wrapper (plain XLA), not per tile."""
    in_dim = p["w11"].shape[0]
    out_dim = p["w13"].shape[1]
    a_out = p["wA"].shape[1]
    total = out_dim + a_out + in_dim
    assert total <= LANE, "packed output slab must fit in 128 lanes"

    # fc13 followed directly by fc21 (no nonlinearity in between) -> fuse
    wmid = p["w13"] @ p["w21"]                       # [64, 64]
    bmid = p["b13"] @ p["w21"] + p["b21"]            # [1, 64]

    # fc13 followed by Amat (no bias) -> fuse for the AN columns
    w13A = p["w13"] @ p["wA"]                        # [64, a_out]
    b13A = p["b13"] @ p["wA"]                        # [1, a_out]

    wout1 = jnp.zeros((64, LANE), jnp.float32)
    wout1 = wout1.at[:, :out_dim].set(p["w13"])
    wout1 = wout1.at[:, out_dim:out_dim + a_out].set(w13A)

    wout2 = jnp.zeros((64, LANE), jnp.float32)
    wout2 = wout2.at[:, out_dim + a_out:total].set(p["w23"])

    bout = jnp.zeros((1, LANE), jnp.float32)
    bout = bout.at[:, :out_dim].set(p["b13"])
    bout = bout.at[:, out_dim:out_dim + a_out].set(b13A)
    bout = bout.at[:, out_dim + a_out:total].set(p["b23"])

    return dict(w11=p["w11"], b11=p["b11"], w12=p["w12"], b12=p["b12"],
                wmid=wmid, bmid=bmid, w22=p["w22"], b22=p["b22"],
                wout1=wout1, wout2=wout2, bout=bout)


def _round_up(n, m):
    return ((n + m - 1) // m) * m


def transformer_forward(x, params, *, tile_m=256):
    batch, in_dim = x.shape
    out_dim = params["w13"].shape[1]
    a_out = params["wA"].shape[1]
    fp = _prepare_fused_params(params)

    # batch tiling: rows are independent, so pad batch to a tile multiple and
    # slice the padding back off after the call.
    tile_m = min(tile_m, _round_up(batch, 8))
    padded = _round_up(batch, tile_m)
    if padded != batch:
        x = jnp.pad(x, ((0, padded - batch), (0, 0)))
    grid = (padded // tile_m,)

    def full_block(arr):
        # weights/biases: whole-array block, constant index map -> VMEM-resident
        return pl.BlockSpec(arr.shape, lambda i: (0, 0))

    args = (x,
            fp["w11"], fp["b11"], fp["w12"], fp["b12"],
            fp["wmid"], fp["bmid"], fp["w22"], fp["b22"],
            fp["wout1"], fp["wout2"], fp["bout"])

    in_specs = ([pl.BlockSpec((tile_m, in_dim), lambda i: (i, 0))]
                + [full_block(a) for a in args[1:]])

    slab = pl.pallas_call(
        transformer_kernel,
        out_shape=jax.ShapeDtypeStruct((padded, LANE), jnp.float32),
        grid=grid,
        in_specs=in_specs,
        out_specs=pl.BlockSpec((tile_m, LANE), lambda i: (i, 0)),
        compiler_params=pltpu.CompilerParams(
            dimension_semantics=("parallel",)),
    )(*args)

    slab = slab[:batch]
    x2z = slab[:, :out_dim]
    an = slab[:, out_dim:out_dim + a_out]
    z2x = slab[:, out_dim + a_out:out_dim + a_out + in_dim]
    return x2z, an, z2x


def transformer_ref(x, p):
    """Pure-JAX reference (unfused), matches the PyTorch forward."""
    def elu(v):
        return jnp.where(v > 0, v, jnp.exp(v) - 1.0)
    h = elu(x @ p["w11"] + p["b11"])
    h = elu(h @ p["w12"] + p["b12"])
    x2z = h @ p["w13"] + p["b13"]
    g = elu(x2z @ p["w21"] + p["b21"])
    g = elu(g @ p["w22"] + p["b22"])
    z2x = g @ p["w23"] + p["b23"]
    an = x2z @ p["wA"]
    return x2z, an, z2x


if __name__ == "__main__":
    # Shapes consistent with the module's "5 -> 4" mapping; batch chosen so the
    # grid actually iterates (and exercises the pad-and-slice path).
    batch, in_dim, out_dim = 500, 5, 4
    A_dim = (out_dim, out_dim)   # Amat: Linear(A_dim[0]=out_dim, A_dim[1], bias=False)

    key = jax.random.PRNGKey(0)
    kx, kp = jax.random.split(key)
    x = jax.random.normal(kx, (batch, in_dim), dtype=jnp.float32)
    params = init_params(kp, in_dim, out_dim, A_dim)

    x2z, an, z2x = transformer_forward(x, params, tile_m=128)
    jax.block_until_ready((x2z, an, z2x))

    # correctness check against the unfused pure-JAX reference
    rx2z, ran, rz2x = transformer_ref(x, params)
    assert x2z.shape == (batch, out_dim) and an.shape == (batch, A_dim[1]) \
        and z2x.shape == (batch, in_dim)
    assert jnp.allclose(x2z, rx2z, atol=1e-4, rtol=1e-4), "x2z mismatch"
    assert jnp.allclose(an, ran, atol=1e-4, rtol=1e-4), "AN mismatch"
    assert jnp.allclose(z2x, rz2x, atol=1e-4, rtol=1e-4), "z2x mismatch"

    print("KERNEL_OK")
</pallas_src>

<mosaic_0001>
module attributes {stable_mosaic.version = 11 : i64} {
  func.func @transformer_kernel(%arg0: i32, %arg1: memref<128x5xf32, #tpu.memory_space<vmem>>, %arg2: memref<5x64xf32, #tpu.memory_space<vmem>>, %arg3: memref<1x64xf32, #tpu.memory_space<vmem>>, %arg4: memref<64x64xf32, #tpu.memory_space<vmem>>, %arg5: memref<1x64xf32, #tpu.memory_space<vmem>>, %arg6: memref<64x64xf32, #tpu.memory_space<vmem>>, %arg7: memref<1x64xf32, #tpu.memory_space<vmem>>, %arg8: memref<64x64xf32, #tpu.memory_space<vmem>>, %arg9: memref<1x64xf32, #tpu.memory_space<vmem>>, %arg10: memref<64x128xf32, #tpu.memory_space<vmem>>, %arg11: memref<64x128xf32, #tpu.memory_space<vmem>>, %arg12: memref<1x128xf32, #tpu.memory_space<vmem>>, %arg13: memref<128x128xf32, #tpu.memory_space<vmem>>) attributes {dimension_semantics = [#tpu.dimension_semantics<parallel>], iteration_bounds = array<i64: 4>, scalar_prefetch = 0 : i64, scratch_operands = 0 : i64, tpu.core_type = #tpu.core_type<tc>, window_params = [{transform_indices = @transform_0, window_bounds = array<i64: 128, 5>}, {pipeline_mode = #tpu.pipeline_mode<synchronous>, transform_indices = @transform_1, window_bounds = array<i64: 5, 64>}, {pipeline_mode = #tpu.pipeline_mode<synchronous>, transform_indices = @transform_2, window_bounds = array<i64: 1, 64>}, {pipeline_mode = #tpu.pipeline_mode<synchronous>, transform_indices = @transform_3, window_bounds = array<i64: 64, 64>}, {pipeline_mode = #tpu.pipeline_mode<synchronous>, transform_indices = @transform_4, window_bounds = array<i64: 1, 64>}, {pipeline_mode = #tpu.pipeline_mode<synchronous>, transform_indices = @transform_5, window_bounds = array<i64: 64, 64>}, {pipeline_mode = #tpu.pipeline_mode<synchronous>, transform_indices = @transform_6, window_bounds = array<i64: 1, 64>}, {pipeline_mode = #tpu.pipeline_mode<synchronous>, transform_indices = @transform_7, window_bounds = array<i64: 64, 64>}, {pipeline_mode = #tpu.pipeline_mode<synchronous>, transform_indices = @transform_8, window_bounds = array<i64: 1, 64>}, {pipeline_mode = #tpu.pipeline_mode<synchronous>, transform_indices = @transform_9, window_bounds = array<i64: 64, 128>}, {pipeline_mode = #tpu.pipeline_mode<synchronous>, transform_indices = @transform_10, window_bounds = array<i64: 64, 128>}, {pipeline_mode = #tpu.pipeline_mode<synchronous>, transform_indices = @transform_11, window_bounds = array<i64: 1, 128>}, {transform_indices = @transform_12, window_bounds = array<i64: 128, 128>}]} {
    %c0 = arith.constant 0 : index
    %c0_0 = arith.constant 0 : index
    %0 = vector.load %arg1[%c0, %c0_0] : memref<128x5xf32, #tpu.memory_space<vmem>>, vector<128x5xf32>
    %c0_1 = arith.constant 0 : index
    %c0_2 = arith.constant 0 : index
    %1 = vector.load %arg3[%c0_1, %c0_2] : memref<1x64xf32, #tpu.memory_space<vmem>>, vector<1x64xf32>
    %c0_3 = arith.constant 0 : index
    %c0_4 = arith.constant 0 : index
    %2 = vector.load %arg5[%c0_3, %c0_4] : memref<1x64xf32, #tpu.memory_space<vmem>>, vector<1x64xf32>
    %c0_5 = arith.constant 0 : index
    %c0_6 = arith.constant 0 : index
    %3 = vector.load %arg7[%c0_5, %c0_6] : memref<1x64xf32, #tpu.memory_space<vmem>>, vector<1x64xf32>
    %c0_7 = arith.constant 0 : index
    %c0_8 = arith.constant 0 : index
    %4 = vector.load %arg9[%c0_7, %c0_8] : memref<1x64xf32, #tpu.memory_space<vmem>>, vector<1x64xf32>
    %c0_9 = arith.constant 0 : index
    %c0_10 = arith.constant 0 : index
    %5 = vector.load %arg12[%c0_9, %c0_10] : memref<1x128xf32, #tpu.memory_space<vmem>>, vector<1x128xf32>
    %c0_11 = arith.constant 0 : index
    %c0_12 = arith.constant 0 : index
    %6 = vector.load %arg2[%c0_11, %c0_12] : memref<5x64xf32, #tpu.memory_space<vmem>>, vector<5x64xf32>
    %cst = arith.constant dense<0.000000e+00> : vector<128x64xf32>
    %7 = tpu.matmul %0, %6, %cst {dimension_numbers = #tpu.dot_dimension_numbers<[1], [0], [0], [1], [0, 0, 1, 1], [], []>} : vector<128x5xf32>, vector<5x64xf32>, vector<128x64xf32> -> vector<128x64xf32>
    %8 = vector.broadcast %1 : vector<1x64xf32> to vector<128x64xf32>
    %9 = arith.addf %7, %8 : vector<128x64xf32>
    %cst_13 = arith.constant 0.000000e+00 : f32
    %10 = vector.broadcast %cst_13 : f32 to vector<128x64xf32>
    %11 = arith.cmpf ogt, %9, %10 : vector<128x64xf32>
    %12 = math.exp %9 : vector<128x64xf32>
    %cst_14 = arith.constant 1.000000e+00 : f32
    %13 = vector.broadcast %cst_14 : f32 to vector<128x64xf32>
    %14 = arith.subf %12, %13 : vector<128x64xf32>
    %15 = arith.select %11, %9, %14 : vector<128x64xi1>, vector<128x64xf32>
    %c0_15 = arith.constant 0 : index
    %c0_16 = arith.constant 0 : index
    %16 = vector.load %arg4[%c0_15, %c0_16] : memref<64x64xf32, #tpu.memory_space<vmem>>, vector<64x64xf32>
    %cst_17 = arith.constant dense<0.000000e+00> : vector<128x64xf32>
    %17 = tpu.matmul %15, %16, %cst_17 {dimension_numbers = #tpu.dot_dimension_numbers<[1], [0], [0], [1], [0, 0, 1, 1], [], []>} : vector<128x64xf32>, vector<64x64xf32>, vector<128x64xf32> -> vector<128x64xf32>
    %18 = vector.broadcast %2 : vector<1x64xf32> to vector<128x64xf32>
    %19 = arith.addf %17, %18 : vector<128x64xf32>
    %cst_18 = arith.constant 0.000000e+00 : f32
    %20 = vector.broadcast %cst_18 : f32 to vector<128x64xf32>
    %21 = arith.cmpf ogt, %19, %20 : vector<128x64xf32>
    %22 = math.exp %19 : vector<128x64xf32>
    %cst_19 = arith.constant 1.000000e+00 : f32
    %23 = vector.broadcast %cst_19 : f32 to vector<128x64xf32>
    %24 = arith.subf %22, %23 : vector<128x64xf32>
    %25 = arith.select %21, %19, %24 : vector<128x64xi1>, vector<128x64xf32>
    %c0_20 = arith.constant 0 : index
    %c0_21 = arith.constant 0 : index
    %26 = vector.load %arg6[%c0_20, %c0_21] : memref<64x64xf32, #tpu.memory_space<vmem>>, vector<64x64xf32>
    %cst_22 = arith.constant dense<0.000000e+00> : vector<128x64xf32>
    %27 = tpu.matmul %25, %26, %cst_22 {dimension_numbers = #tpu.dot_dimension_numbers<[1], [0], [0], [1], [0, 0, 1, 1], [], []>} : vector<128x64xf32>, vector<64x64xf32>, vector<128x64xf32> -> vector<128x64xf32>
    %28 = vector.broadcast %3 : vector<1x64xf32> to vector<128x64xf32>
    %29 = arith.addf %27, %28 : vector<128x64xf32>
    %cst_23 = arith.constant 0.000000e+00 : f32
    %30 = vector.broadcast %cst_23 : f32 to vector<128x64xf32>
    %31 = arith.cmpf ogt, %29, %30 : vector<128x64xf32>
    %32 = math.exp %29 : vector<128x64xf32>
    %cst_24 = arith.constant 1.000000e+00 : f32
    %33 = vector.broadcast %cst_24 : f32 to vector<128x64xf32>
    %34 = arith.subf %32, %33 : vector<128x64xf32>
    %35 = arith.select %31, %29, %34 : vector<128x64xi1>, vector<128x64xf32>
    %c0_25 = arith.constant 0 : index
    %c0_26 = arith.constant 0 : index
    %36 = vector.load %arg8[%c0_25, %c0_26] : memref<64x64xf32, #tpu.memory_space<vmem>>, vector<64x64xf32>
    %cst_27 = arith.constant dense<0.000000e+00> : vector<128x64xf32>
    %37 = tpu.matmul %35, %36, %cst_27 {dimension_numbers = #tpu.dot_dimension_numbers<[1], [0], [0], [1], [0, 0, 1, 1], [], []>} : vector<128x64xf32>, vector<64x64xf32>, vector<128x64xf32> -> vector<128x64xf32>
    %38 = vector.broadcast %4 : vector<1x64xf32> to vector<128x64xf32>
    %39 = arith.addf %37, %38 : vector<128x64xf32>
    %cst_28 = arith.constant 0.000000e+00 : f32
    %40 = vector.broadcast %cst_28 : f32 to vector<128x64xf32>
    %41 = arith.cmpf ogt, %39, %40 : vector<128x64xf32>
    %42 = math.exp %39 : vector<128x64xf32>
    %cst_29 = arith.constant 1.000000e+00 : f32
    %43 = vector.broadcast %cst_29 : f32 to vector<128x64xf32>
    %44 = arith.subf %42, %43 : vector<128x64xf32>
    %45 = arith.select %41, %39, %44 : vector<128x64xi1>, vector<128x64xf32>
    %c0_30 = arith.constant 0 : index
    %c0_31 = arith.constant 0 : index
    %46 = vector.load %arg10[%c0_30, %c0_31] : memref<64x128xf32, #tpu.memory_space<vmem>>, vector<64x128xf32>
    %cst_32 = arith.constant dense<0.000000e+00> : vector<128x128xf32>
    %47 = tpu.matmul %25, %46, %cst_32 {dimension_numbers = #tpu.dot_dimension_numbers<[1], [0], [0], [1], [0, 0, 1, 1], [], []>} : vector<128x64xf32>, vector<64x128xf32>, vector<128x128xf32> -> vector<128x128xf32>
    %c0_33 = arith.constant 0 : index
    %c0_34 = arith.constant 0 : index
    %48 = vector.load %arg11[%c0_33, %c0_34] : memref<64x128xf32, #tpu.memory_space<vmem>>, vector<64x128xf32>
    %cst_35 = arith.constant dense<0.000000e+00> : vector<128x128xf32>
    %49 = tpu.matmul %45, %48, %cst_35 {dimension_numbers = #tpu.dot_dimension_numbers<[1], [0], [0], [1], [0, 0, 1, 1], [], []>} : vector<128x64xf32>, vector<64x128xf32>, vector<128x128xf32> -> vector<128x128xf32>
    %50 = arith.addf %47, %49 : vector<128x128xf32>
    %51 = vector.broadcast %5 : vector<1x128xf32> to vector<128x128xf32>
    %52 = arith.addf %50, %51 : vector<128x128xf32>
    %c0_36 = arith.constant 0 : index
    %c0_37 = arith.constant 0 : index
    %53 = vector.load %arg13[%c0_36, %c0_37] : memref<128x128xf32, #tpu.memory_space<vmem>>, vector<128x128xf32>
    tpu.vector_store %arg13[%c0_36, %c0_37], %52 {strides = array<i32>} : memref<128x128xf32, #tpu.memory_space<vmem>>, vector<128x128xf32>,
    return
  }
  func.func @transform_0(%arg0: i32) -> (i32, i32) {
    %c0_i32 = arith.constant 0 : i32
    %c0_i32_0 = arith.constant 0 : i32
    return %arg0, %c0_i32 : i32, i32
  }
  func.func @transform_1(%arg0: i32) -> (i32, i32) {
    %c0_i32 = arith.constant 0 : i32
    %c0_i32_0 = arith.constant 0 : i32
    %c0_i32_1 = arith.constant 0 : i32
    return %c0_i32, %c0_i32_0 : i32, i32
  }
  func.func @transform_2(%arg0: i32) -> (i32, i32) {
    %c0_i32 = arith.constant 0 : i32
    %c0_i32_0 = arith.constant 0 : i32
    %c0_i32_1 = arith.constant 0 : i32
    return %c0_i32, %c0_i32_0 : i32, i32
  }
  func.func @transform_3(%arg0: i32) -> (i32, i32) {
    %c0_i32 = arith.constant 0 : i32
    %c0_i32_0 = arith.constant 0 : i32
    %c0_i32_1 = arith.constant 0 : i32
    return %c0_i32, %c0_i32_0 : i32, i32
  }
  func.func @transform_4(%arg0: i32) -> (i32, i32) {
    %c0_i32 = arith.constant 0 : i32
    %c0_i32_0 = arith.constant 0 : i32
    %c0_i32_1 = arith.constant 0 : i32
    return %c0_i32, %c0_i32_0 : i32, i32
  }
  func.func @transform_5(%arg0: i32) -> (i32, i32) {
    %c0_i32 = arith.constant 0 : i32
    %c0_i32_0 = arith.constant 0 : i32
    %c0_i32_1 = arith.constant 0 : i32
    return %c0_i32, %c0_i32_0 : i32, i32
  }
  func.func @transform_6(%arg0: i32) -> (i32, i32) {
    %c0_i32 = arith.constant 0 : i32
    %c0_i32_0 = arith.constant 0 : i32
    %c0_i32_1 = arith.constant 0 : i32
    return %c0_i32, %c0_i32_0 : i32, i32
  }
  func.func @transform_7(%arg0: i32) -> (i32, i32) {
    %c0_i32 = arith.constant 0 : i32
    %c0_i32_0 = arith.constant 0 : i32
    %c0_i32_1 = arith.constant 0 : i32
    return %c0_i32, %c0_i32_0 : i32, i32
  }
  func.func @transform_8(%arg0: i32) -> (i32, i32) {
    %c0_i32 = arith.constant 0 : i32
    %c0_i32_0 = arith.constant 0 : i32
    %c0_i32_1 = arith.constant 0 : i32
    return %c0_i32, %c0_i32_0 : i32, i32
  }
  func.func @transform_9(%arg0: i32) -> (i32, i32) {
    %c0_i32 = arith.constant 0 : i32
    %c0_i32_0 = arith.constant 0 : i32
    %c0_i32_1 = arith.constant 0 : i32
    return %c0_i32, %c0_i32_0 : i32, i32
  }
  func.func @transform_10(%arg0: i32) -> (i32, i32) {
    %c0_i32 = arith.constant 0 : i32
    %c0_i32_0 = arith.constant 0 : i32
    %c0_i32_1 = arith.constant 0 : i32
    return %c0_i32, %c0_i32_0 : i32, i32
  }
  func.func @transform_11(%arg0: i32) -> (i32, i32) {
    %c0_i32 = arith.constant 0 : i32
    %c0_i32_0 = arith.constant 0 : i32
    %c0_i32_1 = arith.constant 0 : i32
    return %c0_i32, %c0_i32_0 : i32, i32
  }
  func.func @transform_12(%arg0: i32) -> (i32, i32) {
    %c0_i32 = arith.constant 0 : i32
    %c0_i32_0 = arith.constant 0 : i32
    return %arg0, %c0_i32 : i32, i32
  }
}

</mosaic_0001>

<bundles_post_ra>
// kernel: tpu_custom_call.1
= control target key start
LH: loop header
LB: loop body
LE: loop exit
PB: predicated region body
PF: predicated region fallthrough
CT: control target
= control target key end

     0   :  { %s3747_s0 = inlined_call_operand.vmem [shape: f32[512,5], index: 0, kind: input, shape index: {}]   ;;  %s3748_s1 = inlined_call_operand.vmem [shape: f32[5,64], index: 1, kind: input, shape index: {}]   ;;  %s3749_s2 = inlined_call_operand.vmem [shape: f32[1,64], index: 2, kind: input, shape index: {}]   ;;  %s3750_s3 = inlined_call_operand.vmem [shape: f32[64,64], index: 3, kind: input, shape index: {}]   ;;  %s3751_s4 = inlined_call_operand.vmem [shape: f32[1,64], index: 4, kind: input, shape index: {}]   ;;  %s3752_s5 = inlined_call_operand.vmem [shape: f32[64,64], index: 5, kind: input, shape index: {}]   ;;  %s3753_s6 = inlined_call_operand.vmem [shape: f32[1,64], index: 6, kind: input, shape index: {}]   ;;  %s3754_s7 = inlined_call_operand.vmem [shape: f32[64,64], index: 7, kind: input, shape index: {}]   ;;  %s3755_s8 = inlined_call_operand.vmem [shape: f32[1,64], index: 8, kind: input, shape index: {}]   ;;  %s3756_s9 = inlined_call_operand.vmem [shape: f32[64,128], index: 9, kind: input, shape index: {}]   ;;  %s3757_s10 = inlined_call_operand.vmem [shape: f32[64,128], index: 10, kind: input, shape index: {}]   ;;  %s3758_s11 = inlined_call_operand.vmem [shape: f32[1,128], index: 11, kind: input, shape index: {}]   ;;  %s3759_s12 = inlined_call_operand.hbm [shape: f32[512,128], index: 12, kind: output, shape index: {}]  }
   0x1   :  { %3760 = sst [smem:[#allocation5_spill]] %s3747_s0 }
   0x2   :  { %3761 = sst [smem:[#allocation6_spill]] %s3748_s1 }
   0x3   :  { %17 = vsyncpa [#allocation3], 0 }
   0x4   :  { %19 = vsyncpa [#allocation3 + $0x1], 0  ;;  %s2908_s21 = smov 0   ;;  %s2910_s22 = smov 0  }
   0x5   :  { %s2912_s23 = smov 0   ;;  %s2914_s24 = smov 0  }
   0x6 LB: > { %s2929_s25 = sadd.s32 4294967295, %s2838_s24   ;;  %s2051_s26 = sadd.s32 4294967294, %s2838_s24   ;;  %s2838_s24 = sphi %s2914_s24, %s3769_s24   ;;  %s2834_s23 = sphi %s2912_s23, %s3768_s23   ;;  %s2830_s22 = sphi %s2910_s22, %s3767_s22   ;;  %s2826_s21 = sphi %s2908_s21, %s3766_s21  }
   0x7   : > { %s2933_s27 = sadd.s32 1, %s2838_s24   ;;  %s289_s28 = sadd.s32 1, %s2834_s23 }
   0x8   : > { %s286_s29 = ssub.s32 %s2838_s24, %s2933_s27  ;;  %p299_p0 = scmp.ne.s32.totalorder %s2834_s23, %s2830_s22 }
   0x9   : > { %p287_p1 = scmp.eq.s32.totalorder %s286_s29, 0  ;;  %p300_p2 = scmp.eq.s32.totalorder %s2929_s25, 3 }
   0xa   : > { %p305_p3 = scmp.ne.s32.totalorder %s2830_s22, %s2826_s21  ;;  %p306_p4 = scmp.eq.s32.totalorder %s2051_s26, 3 }
   0xb   : > { %s2944_s30 = scalar_select %p287_p1, %s2834_s23, %s289_s28  }
   0xc   : > { %p2946_p5 = por %p300_p2, %p299_p0  ;;  %p2950_p6 = por %p306_p4, %p305_p3 }
   0xd   : > { %p2054_p7 = scmp.ge.s32.totalorder %s2838_s24, 1  ;;  %p366_p8 = scmp.lt.s32.totalorder %s2838_s24, 5 }
   0xf   : > { %p367_p9 = pnand %p2054_p7, %p366_p8 }
  0x10   : > { %s3764_s1 = sld [smem:[#allocation6_spill]] (!%p367_p9)  ;;  %s2056_s17 = sshll.u32 (!%p367_p9), %s2929_s25, 4 }
  0x11   : > { %370 = sbr.rel (%p367_p9) target bundleno = 1140 (0x474), region = 68  ;;  %p409_p10 = scmp.lt.s32.totalorder (!%p367_p9), %s2056_s17, 63 }
  0x12   : > { %s3765_s0 = sld [smem:[#allocation5_spill]] (!%p367_p9)  ;;  %s405_s20 = sand.u32 (!%p367_p9), 1, %s2830_s22  }
  0x13   : > { %s2229_s16 = sshll.u32 (!%p367_p9), %s2929_s25, 11  ;;  %s3707_s25 = scalar_lea.sflag (!%p367_p9), [#allocation3], %s405_s20 }
  0x14   : > { %s2840_s29 = smov (!%p367_p9), [#allocation2]  }
  0x16   : > { %v436_v0 = vld [vmem:[%s3764_s1] sm:$0x1f]  ;;  %vm492_vm0 = vcmask 1044480   ;;  %s3771_s17 = smov (!%p409_p10, %s2056_s17), 63  ;;  %vm443_vm1 = vcmask 39936   ;;  %v728_v17 = vld [vmem:[%s3750_s3 + $0x38] sm:$0xff] }
  0x17   : > { %2367 = vmatprep.subr.msk.mxu0 %vm492_vm0, %v436_v0  ;;  %s2057_s18 = sshll.u32 %s3771_s17, 3  ;;  %2393 = vmatprep.subr.mxu1 %v728_v17  ;;  %v727_v18 = vld [vmem:[%s3750_s3 + $0x30] sm:$0xff]  ;;  %v726_v19 = vld [vmem:[%s3750_s3 + $0x28] sm:$0xff]  ;;  %v725_v20 = vld [vmem:[%s3750_s3 + $0x20] sm:$0xff]  ;;  %vm735_vm3 = vcmask 523264  }
  0x18   : > { %2368 = vmatpush3.msk.msra.mxu0 %vm492_vm0, %v436_v0  ;;  %s2963_s26 = scalar_lea.vmem %s3765_s0, %s2057_s18  ;;  %2394 = vmatpush3.msra.mxu1 %v728_v17  ;;  %v724_v21 = vld [vmem:[%s3750_s3 + $0x18] sm:$0xff]  ;;  %v723_v22 = vld [vmem:[%s3750_s3 + $0x10] sm:$0xff]  ;;  %v722_v23 = vld [vmem:[%s3750_s3 + $0x8] sm:$0xff] }
  0x19   : > { %v415_v1 = vld [vmem:[%s2963_s26] sm:$0xff]  ;;  %v416_v2 = vld [vmem:[%s2963_s26 + $0x8] sm:$0xff]  ;;  %v417_v3 = vld [vmem:[%s2963_s26 + $0x10] sm:$0xff]  ;;  %2395 = vmatprep.subr.mxu1 %v727_v18 }
  0x1a   : > { %2369 = vmatprep.mubr.msk.f32.mxu0 %vm443_vm1, %v415_v1  ;;  %v418_v4 = vld [vmem:[%s2963_s26 + $0x18] sm:$0xff]  ;;  %v419_v5 = vld [vmem:[%s2963_s26 + $0x20] sm:$0xff]  ;;  %v420_v6 = vld [vmem:[%s2963_s26 + $0x28] sm:$0xff]  ;;  %2396 = vmatpush3.msra.mxu1 %v727_v18 }
  0x1b   : > { %2370 = vmatmul.mubr.msk.f32.vlgmr.msra.gmra.mxu0 %vm443_vm1, %v416_v2  ;;  %v421_v7 = vld [vmem:[%s2963_s26 + $0x30] sm:$0xff]  ;;  %v422_v8 = vld [vmem:[%s2963_s26 + $0x38] sm:$0xff]  ;;  %v423_v9 = vld [vmem:[%s2963_s26 + $0x40] sm:$0xff]  ;;  %2397 = vmatprep.subr.mxu1 %v726_v19 }
  0x1c   : > { %2372 = vmatprep.mubr.msk.f32.mxu0 %vm443_vm1, %v417_v3  ;;  %v424_v10 = vld [vmem:[%s2963_s26 + $0x48] sm:$0xff]  ;;  %v425_v11 = vld [vmem:[%s2963_s26 + $0x50] sm:$0xff]  ;;  %v426_v12 = vld [vmem:[%s2963_s26 + $0x58] sm:$0xff]  ;;  %2398 = vmatpush3.msra.mxu1 %v726_v19 }
  0x1d   : > { %v427_v13 = vld [vmem:[%s2963_s26 + $0x60] sm:$0xff]  ;;  %v428_v14 = vld [vmem:[%s2963_s26 + $0x68] sm:$0xff]  ;;  %v429_v15 = vld [vmem:[%s2963_s26 + $0x70] sm:$0xff]  ;;  %2399 = vmatprep.subr.mxu1 %v725_v20 }
  0x1e   : > { %v430_v16 = vld [vmem:[%s2963_s26 + $0x78] sm:$0xff]  ;;  %2400 = vmatpush3.msra.mxu1 %v725_v20  ;;  %v721_v24 = vld [vmem:[%s3750_s3] sm:$0xff]  ;;  %v1015_v26 = vld [vmem:[%s3752_s5 + $0x30] sm:$0xff]  ;;  %s2055_s26 = sshll.u32 %s405_s20, 7 }
  0x1f   : > { %2373 = vmatmul.mubr.msk.f32.gmra.mxu0 %vm443_vm1, %v418_v4  ;;  %2401 = vmatprep.subr.mxu1 %v724_v21  ;;  %v1016_v25 = vld [vmem:[%s3752_s5 + $0x38] sm:$0xff]  ;;  %v3030_v27 = vld [vmem:[%s3749_s2] ss:$0 sm:$0xff]  ;;  %s3661_s15 = scalar_lea.vmem [#allocation2], %s2055_s26  ;;  %s3698_s26 = scalar_lea.hbm %s3759_s12, %s2229_s16 }
  0x20   : > { %2375 = vmatprep.mubr.msk.f32.mxu0 %vm443_vm1, %v419_v5  ;;  %2402 = vmatpush3.msra.mxu1 %v724_v21  ;;  %s1989_s17 = sshll.u32 %s3661_s15, 4  ;;  %s2782_s16 = sshll.u32 %s2840_s29, 4  ;;  %s3700_s17 = int_to_ptr.vmem [resolvable:$true] %s1989_s17  ;;  %s2783_s16 = int_to_ptr.vmem [resolvable:$false] %s2782_s16 }
  0x21   : > { %2403 = vmatprep.subr.mxu1 %v723_v22  ;;  %2433 = vmatprep.subr.mxu0 %v1016_v25  ;;  %s2778_s28 = scalar_lea.vmem %s3700_s17, 2048  ;;  %s2784_s18 = scalar_lea.vmem %s2783_s16, 4096 }
  0x22   : > { %2404 = vmatpush3.msra.mxu1 %v723_v22  ;;  %2434 = vmatpush3.msra.mxu0 %v1016_v25  ;;  %p2779_p11 = scmp.ne.s32.totalorder %s3700_s17, %s2778_s28  ;;  %p2785_p0 = scmp.lt.s32.totalorder %s3700_s17, %s2783_s16 }
  0x23   : > { %2376 = vmatmul.mubr.msk.f32.gmra.mxu0 %vm443_vm1, %v420_v6  ;;  %2405 = vmatprep.subr.mxu1 %v722_v23  ;;  %p2786_p1 = scmp.lt.s32.totalorder %s2784_s18, %s2778_s28 }
  0x24   : > { %2378 = vmatprep.mubr.msk.f32.mxu0 %vm443_vm1, %v421_v7  ;;  %2406 = vmatpush3.msra.mxu1 %v722_v23  ;;  %p2780_p12 = pnand %p2779_p11, %p2946_p5 }
  0x25   : > { %2407 = vmatprep.subr.mxu1 %v721_v24  ;;  %2435 = vmatprep.subr.mxu0 %v1015_v26  ;;  %p2787_p2 = por %p2786_p1, %p2785_p0 }
  0x26   : > { %2408 = vmatpush3.msra.mxu1 %v721_v24  ;;  %2436 = vmatpush3.msra.mxu0 %v1015_v26  ;;  %p2781_p13 = pneg %p2780_p12 }
  0x27   : > { %2379 = vmatmul.mubr.msk.f32.gmra.mxu0 %vm443_vm1, %v422_v8 }
  0x28   : > { %2381 = vmatprep.mubr.msk.f32.mxu0 %vm443_vm1, %v423_v9  ;;  %p2788_p3 = pnand %p2787_p2, %p2781_p13 }
  0x2b   : > { %2382 = vmatmul.mubr.msk.f32.gmra.mxu0 %vm443_vm1, %v424_v10 }
  0x2c   : > { %2384 = vmatprep.mubr.msk.f32.mxu0 %vm443_vm1, %v425_v11 }
  0x2f   : > { %2385 = vmatmul.mubr.msk.f32.gmra.mxu0 %vm443_vm1, %v426_v12 }
  0x30   : > { %2387 = vmatprep.mubr.msk.f32.mxu0 %vm443_vm1, %v427_v13 }
  0x33   : > { %2388 = vmatmul.mubr.msk.f32.gmra.mxu0 %vm443_vm1, %v428_v14 }
  0x34   : > { %2390 = vmatprep.mubr.msk.f32.mxu0 %vm443_vm1, %v429_v15 }
  0x37   : > { %2391 = vmatmul.mubr.msk.f32.gmra.mxu0 %vm443_vm1, %v430_v16 }
  0xdb   : > { %v2371_v28 = vpop.f32.mrf.mxu0 }
  0xdc   : > { %v568_v29 = vadd.f32 %v2371_v28, %v3030_v27 }
  0xdd   : > { %v562_v30 = vpop.f32.mrf.mxu0 }
  0xde   : > { %v659_v31 = vmul.f32 1.442695, %v568_v29  ;;  %v563_v32 = vadd.f32 %v3030_v27, %v562_v30  ;;  %vm642_vm2 = vcmp.gt.f32.partialorder %v568_v29, 0.0 }
  0xdf   : > { %v2374_v33 = vpop.f32.mrf.mxu0 }
  0xe0   : > { %2650 = vpow2.f32 %v659_v31  ;;  %v657_v34 = vmul.f32 1.442695, %v563_v32  ;;  %v3035_v35 = vadd.f32 %v2374_v33, %v3030_v27  ;;  %vm641_vm4 = vcmp.gt.f32.partialorder %v563_v32, 0.0 }
  0xe1   : > { %v572_v36 = vpop.f32.mrf.mxu0 }
  0xe2   : > { %2652 = vpow2.f32 %v657_v34  ;;  %v663_v37 = vmul.f32 1.442695, %v3035_v35  ;;  %v573_v38 = vadd.f32 %v3030_v27, %v572_v36  ;;  %vm644_vm6 = vcmp.gt.f32.partialorder %v3035_v35, 0.0 }
  0xe3   : > { %v2377_v39 = vpop.f32.mrf.mxu0 }
  0xe4   : > { %2654 = vpow2.f32 %v663_v37  ;;  %v661_v40 = vmul.f32 1.442695, %v573_v38  ;;  %v3040_v41 = vadd.f32 %v2377_v39, %v3030_v27  ;;  %vm643_vm5 = vcmp.gt.f32.partialorder %v573_v38, 0.0 }
  0xe5   : > { %v582_v42 = vpop.f32.mrf.mxu0 }
  0xe6   : > { %2656 = vpow2.f32 %v661_v40  ;;  %v667_v43 = vmul.f32 1.442695, %v3040_v41  ;;  %v3044_v44 = vadd.f32 %v3030_v27, %v582_v42  ;;  %vm646_vm7 = vcmp.gt.f32.partialorder %v3040_v41, 0.0 }
  0xe7   : > { %v2380_v45 = vpop.f32.mrf.mxu0 }
  0xe8   : > { %2658 = vpow2.f32 %v667_v43  ;;  %v665_v46 = vmul.f32 1.442695, %v3044_v44  ;;  %v3048_v47 = vadd.f32 %v2380_v45, %v3030_v27  ;;  %vm645_vm8 = vcmp.gt.f32.partialorder %v3044_v44, 0.0 }
  0xe9   : > { %v592_v48 = vpop.f32.mrf.mxu0 }
  0xea   : > { %2660 = vpow2.f32 %v665_v46  ;;  %v671_v49 = vmul.f32 1.442695, %v3048_v47  ;;  %v3052_v50 = vadd.f32 %v3030_v27, %v592_v48  ;;  %vm648_vm10 = vcmp.gt.f32.partialorder %v3048_v47, 0.0 }
  0xeb   : > { %v2383_v51 = vpop.f32.mrf.mxu0 }
  0xec   : > { %2662 = vpow2.f32 %v671_v49  ;;  %v669_v52 = vmul.f32 1.442695, %v3052_v50  ;;  %v3056_v53 = vadd.f32 %v2383_v51, %v3030_v27  ;;  %vm647_vm9 = vcmp.gt.f32.partialorder %v3052_v50, 0.0 }
  0xed   : > { %v2651_v54 = vpop.eup %2650  ;;  %v602_v55 = vpop.f32.mrf.mxu0 }
  0xee   : > { %2664 = vpow2.f32 %v669_v52  ;;  %v675_v56 = vmul.f32 1.442695, %v3056_v53  ;;  %v3060_v57 = vadd.f32 %v3030_v27, %v602_v55  ;;  %v2077_v60 = vadd.f32 -1.0, %v2651_v54 }
  0xef   : > { %v2653_v58 = vpop.eup %2652  ;;  %v2386_v59 = vpop.f32.mrf.mxu0  ;;  %vm650_vm12 = vcmp.gt.f32.partialorder %v3056_v53, 0.0 }
  0xf0   : > { %2666 = vpow2.f32 %v675_v56  ;;  %v673_v61 = vmul.f32 1.442695, %v3060_v57  ;;  %v3064_v62 = vadd.f32 %v2386_v59, %v3030_v27  ;;  %v2076_v1 = vadd.f32 -1.0, %v2653_v58 }
  0xf1   : > { %v2655_v63 = vpop.eup %2654  ;;  %v612_v0 = vpop.f32.mrf.mxu0  ;;  %v706_v7 = vsel %vm642_vm2, %v568_v29, %v2077_v60  ;;  %vm649_vm11 = vcmp.gt.f32.partialorder %v3060_v57, 0.0  ;;  %v1014_v60 = vld [vmem:[%s3752_s5 + $0x28] sm:$0xff] }
  0xf2   : > { %2668 = vpow2.f32 %v673_v61  ;;  %v679_v2 = vmul.f32 1.442695, %v3064_v62  ;;  %v3068_v3 = vadd.f32 %v3030_v27, %v612_v0  ;;  %v705_v6 = vsel %vm641_vm4, %v563_v32, %v2076_v1  ;;  %2437 = vmatprep.subr.mxu0 %v1014_v60  ;;  %v1013_v61 = vld [vmem:[%s3752_s5 + $0x20] sm:$0xff]  ;;  %v1010_v0 = vld [vmem:[%s3752_s5 + $0x8] sm:$0xff] }
  0xf3   : > { %v2657_v4 = vpop.eup %2656  ;;  %v2389_v5 = vpop.f32.mrf.mxu0  ;;  %2409 = vmatprep.mubr.msk.f32.mxu1 %vm735_vm3, %v705_v6  ;;  %v2079_v10 = vadd.f32 -1.0, %v2655_v63  ;;  %vm652_vm14 = vcmp.gt.f32.partialorder %v3064_v62, 0.0  ;;  %2438 = vmatpush3.msra.mxu0 %v1014_v60  ;;  %v1011_v63 = vld [vmem:[%s3752_s5 + $0x10] sm:$0xff]  ;;  %v1009_v1 = vld [vmem:[%s3752_s5] sm:$0xff] }
  0xf4   : > { %2670 = vpow2.f32 %v679_v2  ;;  %v677_v8 = vmul.f32 1.442695, %v3068_v3  ;;  %v3072_v9 = vadd.f32 %v2389_v5, %v3030_v27  ;;  %2410 = vmatmul.mubr.msk.f32.vlgmr.msra.gmra.mxu1 %vm735_vm3, %v706_v7  ;;  %v2078_v13 = vadd.f32 -1.0, %v2657_v4  ;;  %2439 = vmatprep.subr.mxu0 %v1013_v61  ;;  %v1303_v2 = vld [vmem:[%s3754_s7 + $0x38] sm:$0xff]  ;;  %v3151_v4 = vld [vmem:[%s3751_s4] ss:$0 sm:$0xff] }
  0xf5   : > { %v2659_v11 = vpop.eup %2658  ;;  %v622_v12 = vpop.f32.mrf.mxu0  ;;  %v708_v22 = vsel %vm644_vm6, %v3035_v35, %v2079_v10  ;;  %vm651_vm13 = vcmp.gt.f32.partialorder %v3068_v3, 0.0  ;;  %2440 = vmatpush3.msra.mxu0 %v1013_v61  ;;  %2473 = vmatprep.subr.mxu1 %v1303_v2 }
  0xf6   : > { %2672 = vpow2.f32 %v677_v8  ;;  %v683_v14 = vmul.f32 1.442695, %v3072_v9  ;;  %v3078_v15 = vadd.f32 %v3030_v27, %v622_v12  ;;  %v707_v18 = vsel %vm643_vm5, %v573_v38, %v2078_v13  ;;  %2474 = vmatpush3.msra.mxu1 %v1303_v2 }
  0xf7   : > { %v2661_v16 = vpop.eup %2660  ;;  %v2392_v17 = vpop.f32.mrf.mxu0  ;;  %v2081_v19 = vadd.f32 -1.0, %v2659_v11  ;;  %2412 = vmatprep.mubr.msk.f32.mxu1 %vm735_vm3, %v707_v18  ;;  %vm654_vm0 = vcmp.gt.f32.partialorder %v3072_v9, 0.0 }
  0xf8   : > { %2674 = vpow2.f32 %v683_v14  ;;  %v681_v20 = vmul.f32 1.442695, %v3078_v15  ;;  %v3083_v21 = vadd.f32 %v2392_v17, %v3030_v27  ;;  %2413 = vmatmul.mubr.msk.f32.gmra.mxu1 %vm735_vm3, %v708_v22  ;;  %v2080_v25 = vadd.f32 -1.0, %v2661_v16 }
  0xf9   : > { %v2663_v23 = vpop.eup %2662  ;;  %v632_v24 = vpop.f32.mrf.mxu0  ;;  %v710_v31 = vsel %vm646_vm7, %v3040_v41, %v2081_v19  ;;  %vm653_vm15 = vcmp.gt.f32.partialorder %v3078_v15, 0.0 }
  0xfa   : > { %2676 = vpow2.f32 %v681_v20  ;;  %v687_v26 = vmul.f32 1.442695, %v3083_v21  ;;  %v633_v28 = vadd.f32 %v3030_v27, %v632_v24  ;;  %v709_v30 = vsel %vm645_vm8, %v3044_v44, %v2080_v25 }
  0xfb   : > { %v2665_v29 = vpop.eup %2664  ;;  %2415 = vmatprep.mubr.msk.f32.mxu1 %vm735_vm3, %v709_v30  ;;  %v2083_v34 = vadd.f32 -1.0, %v2663_v23  ;;  %vm656_vm2 = vcmp.gt.f32.partialorder %v3083_v21, 0.0 }
  0xfc   : > { %2678 = vpow2.f32 %v687_v26  ;;  %v685_v32 = vmul.f32 1.442695, %v633_v28  ;;  %v2082_v33 = vadd.f32 -1.0, %v2665_v29  ;;  %2416 = vmatmul.mubr.msk.f32.gmra.mxu1 %vm735_vm3, %v710_v31  ;;  %vm655_vm1 = vcmp.gt.f32.partialorder %v633_v28, 0.0 }
  0xfd   : > { %v2667_v35 = vpop.eup %2666  ;;  %v712_v37 = vsel %vm648_vm10, %v3048_v47, %v2083_v34 }
  0xfe   : > { %2680 = vpow2.f32 %v685_v32  ;;  %v711_v36 = vsel %vm647_vm9, %v3052_v50, %v2082_v33  ;;  %v2085_v39 = vadd.f32 -1.0, %v2667_v35 }
  0xff   : > { %v2669_v27 = vpop.eup %2668  ;;  %2418 = vmatprep.mubr.msk.f32.mxu1 %vm735_vm3, %v711_v36 }
 0x100   : > { %v2084_v38 = vadd.f32 -1.0, %v2669_v27  ;;  %2419 = vmatmul.mubr.msk.f32.gmra.mxu1 %vm735_vm3, %v712_v37  ;;  %v714_v43 = vsel %vm650_vm12, %v3056_v53, %v2085_v39 }
 0x101   : > { %v2671_v40 = vpop.eup %2670 }
 0x102   : > { %v713_v41 = vsel %vm649_vm11, %v3060_v57, %v2084_v38  ;;  %v2087_v45 = vadd.f32 -1.0, %v2671_v40 }
 0x103   : > { %v2673_v42 = vpop.eup %2672  ;;  %2421 = vmatprep.mubr.msk.f32.mxu1 %vm735_vm3, %v713_v41 }
 0x104   : > { %v2086_v44 = vadd.f32 -1.0, %v2673_v42  ;;  %2422 = vmatmul.mubr.msk.f32.gmra.mxu1 %vm735_vm3, %v714_v43  ;;  %v716_v49 = vsel %vm652_vm14, %v3064_v62, %v2087_v45  ;;  %v1012_v62 = vld [vmem:[%s3752_s5 + $0x18] sm:$0xff] }
 0x105   : > { %v2675_v46 = vpop.eup %2674  ;;  %2441 = vmatprep.subr.mxu0 %v1012_v62 }
 0x106   : > { %v715_v47 = vsel %vm651_vm13, %v3068_v3, %v2086_v44  ;;  %v2089_v51 = vadd.f32 -1.0, %v2675_v46  ;;  %2442 = vmatpush3.msra.mxu0 %v1012_v62  ;;  %v1302_v3 = vld [vmem:[%s3754_s7 + $0x30] sm:$0xff] }
 0x107   : > { %v2677_v48 = vpop.eup %2676  ;;  %2424 = vmatprep.mubr.msk.f32.mxu1 %vm735_vm3, %v715_v47  ;;  %2443 = vmatprep.subr.mxu0 %v1011_v63 }
 0x108   : > { %v2088_v50 = vadd.f32 -1.0, %v2677_v48  ;;  %2425 = vmatmul.mubr.msk.f32.gmra.mxu1 %vm735_vm3, %v716_v49  ;;  %v718_v55 = vsel %vm654_vm0, %v3072_v9, %v2089_v51  ;;  %2444 = vmatpush3.msra.mxu0 %v1011_v63 }
 0x109   : > { %v2679_v52 = vpop.eup %2678  ;;  %2445 = vmatprep.subr.mxu0 %v1010_v0  ;;  %2475 = vmatprep.subr.mxu1 %v1302_v3 }
 0x10a   : > { %v717_v53 = vsel %vm653_vm15, %v3078_v15, %v2088_v50  ;;  %v2091_v57 = vadd.f32 -1.0, %v2679_v52  ;;  %2446 = vmatpush3.msra.mxu0 %v1010_v0  ;;  %2476 = vmatpush3.msra.mxu1 %v1302_v3 }
 0x10b   : > { %v2681_v54 = vpop.eup %2680  ;;  %2427 = vmatprep.mubr.msk.f32.mxu1 %vm735_vm3, %v717_v53  ;;  %2447 = vmatprep.subr.mxu0 %v1009_v1 }
 0x10c   : > { %v2090_v56 = vadd.f32 -1.0, %v2681_v54  ;;  %2428 = vmatmul.mubr.msk.f32.gmra.mxu1 %vm735_vm3, %v718_v55  ;;  %v720_v59 = vsel %vm656_vm2, %v3083_v21, %v2091_v57  ;;  %2448 = vmatpush3.msra.mxu0 %v1009_v1 }
 0x10e   : > { %v719_v58 = vsel %vm655_vm1, %v633_v28, %v2090_v56 }
 0x10f   : > { %2430 = vmatprep.mubr.msk.f32.mxu1 %vm735_vm3, %v719_v58 }
 0x110   : > { %2431 = vmatmul.mubr.msk.f32.gmra.mxu1 %vm735_vm3, %v720_v59 }
 0x1b4   : > { %v2411_v5 = vpop.f32.mrf.mxu1 }
 0x1b5   : > { %v856_v6 = vadd.f32 %v2411_v5, %v3151_v4 }
 0x1b6   : > { %v850_v7 = vpop.f32.mrf.mxu1 }
 0x1b7   : > { %v947_v8 = vmul.f32 1.442695, %v856_v6  ;;  %v851_v9 = vadd.f32 %v3151_v4, %v850_v7  ;;  %vm930_vm5 = vcmp.gt.f32.partialorder %v856_v6, 0.0 }
 0x1b8   : > { %v2414_v10 = vpop.f32.mrf.mxu1 }
 0x1b9   : > { %2682 = vpow2.f32 %v947_v8  ;;  %v945_v11 = vmul.f32 1.442695, %v851_v9  ;;  %v3156_v12 = vadd.f32 %v2414_v10, %v3151_v4  ;;  %vm929_vm4 = vcmp.gt.f32.partialorder %v851_v9, 0.0 }
 0x1ba   : > { %v860_v13 = vpop.f32.mrf.mxu1 }
 0x1bb   : > { %2684 = vpow2.f32 %v945_v11  ;;  %v951_v14 = vmul.f32 1.442695, %v3156_v12  ;;  %v861_v15 = vadd.f32 %v3151_v4, %v860_v13  ;;  %vm932_vm7 = vcmp.gt.f32.partialorder %v3156_v12, 0.0 }
 0x1bc   : > { %v2417_v16 = vpop.f32.mrf.mxu1 }
 0x1bd   : > { %2686 = vpow2.f32 %v951_v14  ;;  %v949_v17 = vmul.f32 1.442695, %v861_v15  ;;  %v3161_v18 = vadd.f32 %v2417_v16, %v3151_v4  ;;  %vm931_vm6 = vcmp.gt.f32.partialorder %v861_v15, 0.0 }
 0x1be   : > { %v870_v19 = vpop.f32.mrf.mxu1 }
 0x1bf   : > { %2688 = vpow2.f32 %v949_v17  ;;  %v955_v20 = vmul.f32 1.442695, %v3161_v18  ;;  %v3165_v21 = vadd.f32 %v3151_v4, %v870_v19  ;;  %vm934_vm8 = vcmp.gt.f32.partialorder %v3161_v18, 0.0 }
 0x1c0   : > { %v2420_v22 = vpop.f32.mrf.mxu1 }
 0x1c1   : > { %2690 = vpow2.f32 %v955_v20  ;;  %v953_v23 = vmul.f32 1.442695, %v3165_v21  ;;  %v3169_v24 = vadd.f32 %v2420_v22, %v3151_v4  ;;  %vm933_vm9 = vcmp.gt.f32.partialorder %v3165_v21, 0.0 }
 0x1c2   : > { %v880_v25 = vpop.f32.mrf.mxu1 }
 0x1c3   : > { %2692 = vpow2.f32 %v953_v23  ;;  %v959_v26 = vmul.f32 1.442695, %v3169_v24  ;;  %v3173_v28 = vadd.f32 %v3151_v4, %v880_v25  ;;  %vm936_vm11 = vcmp.gt.f32.partialorder %v3169_v24, 0.0 }
 0x1c4   : > { %v2423_v29 = vpop.f32.mrf.mxu1 }
 0x1c5   : > { %2694 = vpow2.f32 %v959_v26  ;;  %v957_v30 = vmul.f32 1.442695, %v3173_v28  ;;  %v3177_v31 = vadd.f32 %v2423_v29, %v3151_v4  ;;  %vm935_vm10 = vcmp.gt.f32.partialorder %v3173_v28, 0.0 }
 0x1c6   : > { %v2683_v32 = vpop.eup %2682  ;;  %v890_v33 = vpop.f32.mrf.mxu1 }
 0x1c7   : > { %2696 = vpow2.f32 %v957_v30  ;;  %v963_v34 = vmul.f32 1.442695, %v3177_v31  ;;  %v2110_v36 = vadd.f32 -1.0, %v2683_v32  ;;  %v3181_v27 = vadd.f32 %v3151_v4, %v890_v33 }
 0x1c8   : > { %v2685_v35 = vpop.eup %2684  ;;  %v2426_v37 = vpop.f32.mrf.mxu1  ;;  %vm938_vm13 = vcmp.gt.f32.partialorder %v3177_v31, 0.0 }
 0x1c9   : > { %2698 = vpow2.f32 %v963_v34  ;;  %v3184_v38 = vadd.f32 %v2426_v37, %v3151_v4  ;;  %v2109_v39 = vadd.f32 -1.0, %v2685_v35  ;;  %v961_v41 = vmul.f32 1.442695, %v3181_v27  ;;  %v1301_v37 = vld [vmem:[%s3754_s7 + $0x28] sm:$0xff] }
 0x1ca   : > { %v2687_v40 = vpop.eup %2686  ;;  %v900_v42 = vpop.f32.mrf.mxu1  ;;  %v3193_v47 = vsel %vm930_vm5, %v856_v6, %v2110_v36  ;;  %vm937_vm12 = vcmp.gt.f32.partialorder %v3181_v27, 0.0  ;;  %2477 = vmatprep.subr.mxu1 %v1301_v37 }
 0x1cb   : > { %v967_v43 = vmul.f32 1.442695, %v3184_v38  ;;  %v3189_v44 = vadd.f32 %v3151_v4, %v900_v42  ;;  %v3191_v45 = vsel %vm929_vm4, %v851_v9, %v2109_v39  ;;  %2700 = vpow2.f32 %v961_v41  ;;  %2478 = vmatpush3.msra.mxu1 %v1301_v37  ;;  %v1299_v39 = vld [vmem:[%s3754_s7 + $0x18] sm:$0xff]  ;;  %v1297_v41 = vld [vmem:[%s3754_s7 + $0x8] sm:$0xff]  ;;  %v1296_v42 = vld [vmem:[%s3754_s7] sm:$0xff] }
 0x1cc   : > { %v2689_v46 = vpop.eup %2688  ;;  %v2429_v48 = vpop.f32.mrf.mxu1  ;;  %2449 = vmatprep.mubr.msk.f32.mxu0 %vm735_vm3, %v3191_v45  ;;  %v2112_v51 = vadd.f32 -1.0, %v2687_v40  ;;  %vm940_vm15 = vcmp.gt.f32.partialorder %v3184_v38, 0.0  ;;  %v1298_v40 = vld [vmem:[%s3754_s7 + $0x10] sm:$0xff] }
 0x1cd   : > { %2702 = vpow2.f32 %v967_v43  ;;  %v965_v49 = vmul.f32 1.442695, %v3189_v44  ;;  %v3199_v50 = vadd.f32 %v2429_v48, %v3151_v4  ;;  %2450 = vmatmul.mubr.msk.f32.vlgmr.msra.gmra.mxu0 %vm735_vm3, %v3193_v47  ;;  %v2111_v54 = vadd.f32 -1.0, %v2689_v46  ;;  %v3314_v43 = vld [vmem:[%s3756_s9 + $0x38] sm:$0xff]  ;;  %v1597_v46 = vld [vmem:[%s3757_s10 + $0x30] sm:$0xff] }
 0x1ce   : > { %v2691_v52 = vpop.eup %2690  ;;  %v910_v53 = vpop.f32.mrf.mxu1  ;;  %v3217_v63 = vsel %vm932_vm7, %v3156_v12, %v2112_v51  ;;  %vm939_vm14 = vcmp.gt.f32.partialorder %v3189_v44, 0.0  ;;  %v3326_v48 = vld [vmem:[%s3753_s6] ss:$0 sm:$0xff] }
 0x1cf   : > { %2704 = vpow2.f32 %v965_v49  ;;  %v971_v55 = vmul.f32 1.442695, %v3199_v50  ;;  %v3205_v56 = vadd.f32 %v3151_v4, %v910_v53  ;;  %v3208_v59 = vsel %vm931_vm6, %v861_v15, %v2111_v54 }
 0x1d0   : > { %v2693_v57 = vpop.eup %2692  ;;  %v2432_v58 = vpop.f32.mrf.mxu1  ;;  %v2114_v60 = vadd.f32 -1.0, %v2691_v52  ;;  %2452 = vmatprep.mubr.msk.f32.mxu0 %vm735_vm3, %v3208_v59  ;;  %vm942_vm1 = vcmp.gt.f32.partialorder %v3199_v50, 0.0 }
 0x1d1   : > { %2706 = vpow2.f32 %v971_v55  ;;  %v969_v61 = vmul.f32 1.442695, %v3205_v56  ;;  %v3212_v62 = vadd.f32 %v2432_v58, %v3151_v4  ;;  %2453 = vmatmul.mubr.msk.f32.gmra.mxu0 %vm735_vm3, %v3217_v63  ;;  %v2113_v2 = vadd.f32 -1.0, %v2693_v57 }
 0x1d2   : > { %v2695_v0 = vpop.eup %2694  ;;  %v920_v1 = vpop.f32.mrf.mxu1  ;;  %v3229_v8 = vsel %vm934_vm8, %v3161_v18, %v2114_v60  ;;  %vm941_vm0 = vcmp.gt.f32.partialorder %v3205_v56, 0.0 }
 0x1d3   : > { %2708 = vpow2.f32 %v969_v61  ;;  %v975_v3 = vmul.f32 1.442695, %v3212_v62  ;;  %v921_v5 = vadd.f32 %v3151_v4, %v920_v1  ;;  %v3226_v7 = vsel %vm933_vm9, %v3165_v21, %v2113_v2 }
 0x1d4   : > { %v2697_v6 = vpop.eup %2696  ;;  %2455 = vmatprep.mubr.msk.f32.mxu0 %vm735_vm3, %v3226_v7  ;;  %v2116_v11 = vadd.f32 -1.0, %v2695_v0  ;;  %vm944_vm4 = vcmp.gt.f32.partialorder %v3212_v62, 0.0 }
 0x1d5   : > { %2710 = vpow2.f32 %v975_v3  ;;  %v973_v9 = vmul.f32 1.442695, %v921_v5  ;;  %v2115_v10 = vadd.f32 -1.0, %v2697_v6  ;;  %2456 = vmatmul.mubr.msk.f32.gmra.mxu0 %vm735_vm3, %v3229_v8  ;;  %vm943_vm2 = vcmp.gt.f32.partialorder %v921_v5, 0.0 }
 0x1d6   : > { %v2699_v12 = vpop.eup %2698  ;;  %v3243_v14 = vsel %vm936_vm11, %v3169_v24, %v2116_v11 }
 0x1d7   : > { %2712 = vpow2.f32 %v973_v9  ;;  %v3237_v4 = vsel %vm935_vm10, %v3173_v28, %v2115_v10  ;;  %v2118_v15 = vadd.f32 -1.0, %v2699_v12 }
 0x1d8   : > { %2458 = vmatprep.mubr.msk.f32.mxu0 %vm735_vm3, %v3237_v4  ;;  %v2701_v13 = vpop.eup %2700 }
 0x1d9   : > { %2459 = vmatmul.mubr.msk.f32.gmra.mxu0 %vm735_vm3, %v3243_v14  ;;  %v2117_v17 = vadd.f32 -1.0, %v2701_v13  ;;  %v3255_v20 = vsel %vm938_vm13, %v3177_v31, %v2118_v15 }
 0x1da   : > { %v2703_v16 = vpop.eup %2702 }
 0x1db   : > { %v3250_v19 = vsel %vm937_vm12, %v3181_v27, %v2117_v17  ;;  %v2120_v22 = vadd.f32 -1.0, %v2703_v16 }
 0x1dc   : > { %v2705_v18 = vpop.eup %2704  ;;  %2461 = vmatprep.mubr.msk.f32.mxu0 %vm735_vm3, %v3250_v19 }
 0x1dd   : > { %v2119_v21 = vadd.f32 -1.0, %v2705_v18  ;;  %2462 = vmatmul.mubr.msk.f32.gmra.mxu0 %vm735_vm3, %v3255_v20  ;;  %v3267_v26 = vsel %vm940_vm15, %v3184_v38, %v2120_v22  ;;  %v1300_v38 = vld [vmem:[%s3754_s7 + $0x20] sm:$0xff] }
 0x1de   : > { %v2707_v23 = vpop.eup %2706  ;;  %2479 = vmatprep.subr.mxu1 %v1300_v38 }
 0x1df   : > { %v3261_v24 = vsel %vm939_vm14, %v3189_v44, %v2119_v21  ;;  %v2122_v29 = vadd.f32 -1.0, %v2707_v23  ;;  %2480 = vmatpush3.msra.mxu1 %v1300_v38  ;;  %v1598_v44 = vld [vmem:[%s3757_s10 + $0x38] sm:$0xff] }
 0x1e0   : > { %v2709_v25 = vpop.eup %2708  ;;  %2464 = vmatprep.mubr.msk.f32.mxu0 %vm735_vm3, %v3261_v24  ;;  %2481 = vmatprep.subr.mxu1 %v1299_v39 }
 0x1e1   : > { %v2121_v28 = vadd.f32 -1.0, %v2709_v25  ;;  %2465 = vmatmul.mubr.msk.f32.gmra.mxu0 %vm735_vm3, %v3267_v26  ;;  %v3279_v33 = vsel %vm942_vm1, %v3199_v50, %v2122_v29  ;;  %2482 = vmatpush3.msra.mxu1 %v1299_v39 }
 0x1e2   : > { %v2711_v30 = vpop.eup %2710  ;;  %2483 = vmatprep.subr.mxu1 %v1298_v40  ;;  %2513 = vmatprep.subr.mxu0 %v1598_v44 }
 0x1e3   : > { %v3273_v31 = vsel %vm941_vm0, %v3205_v56, %v2121_v28  ;;  %v2124_v35 = vadd.f32 -1.0, %v2711_v30  ;;  %2484 = vmatpush3.msra.mxu1 %v1298_v40  ;;  %2514 = vmatpush3.msra.mxu0 %v1598_v44 }
 0x1e4   : > { %v2713_v32 = vpop.eup %2712  ;;  %2467 = vmatprep.mubr.msk.f32.mxu0 %vm735_vm3, %v3273_v31  ;;  %2485 = vmatprep.subr.mxu1 %v1297_v41 }
 0x1e5   : > { %v2123_v34 = vadd.f32 -1.0, %v2713_v32  ;;  %2468 = vmatmul.mubr.msk.f32.gmra.mxu0 %vm735_vm3, %v3279_v33  ;;  %v3289_v27 = vsel %vm944_vm4, %v3212_v62, %v2124_v35  ;;  %2486 = vmatpush3.msra.mxu1 %v1297_v41  ;;  %v3373_v41 = vld [vmem:[%s3756_s9 + $0x30] sm:$0xff] }
 0x1e6   : > { %2487 = vmatprep.subr.mxu1 %v1296_v42  ;;  %2515 = vmatprep.subr.mxu0 %v1597_v46 }
 0x1e7   : > { %v3283_v36 = vsel %vm943_vm2, %v921_v5, %v2123_v34  ;;  %2488 = vmatpush3.msra.mxu1 %v1296_v42  ;;  %2516 = vmatpush3.msra.mxu0 %v1597_v46 }
 0x1e8   : > { %2470 = vmatprep.mubr.msk.f32.mxu0 %vm735_vm3, %v3283_v36  ;;  %2593 = vmatprep.subr.mxu1 %v3314_v43 }
 0x1e9   : > { %2471 = vmatmul.mubr.msk.f32.gmra.mxu0 %vm735_vm3, %v3289_v27 }
 0x28d   : > { %v2451_v49 = vpop.f32.mrf.mxu0 }
 0x28e   : > { %v1143_v50 = vadd.f32 %v2451_v49, %v3326_v48 }
 0x28f   : > { %v1137_v51 = vpop.f32.mrf.mxu0 }
 0x290   : > { %v1234_v52 = vmul.f32 1.442695, %v1143_v50  ;;  %v1138_v53 = vadd.f32 %v3326_v48, %v1137_v51  ;;  %vm1217_vm6 = vcmp.gt.f32.partialorder %v1143_v50, 0.0  ;;  %v3384_v51 = vld [vmem:[%s3756_s9 + $0x28] sm:$0xff] }
 0x291   : > { %v2454_v55 = vpop.f32.mrf.mxu0 }
 0x292   : > { %2714 = vpow2.f32 %v1234_v52  ;;  %v1232_v54 = vmul.f32 1.442695, %v1138_v53  ;;  %v3331_v56 = vadd.f32 %v2454_v55, %v3326_v48  ;;  %vm1216_vm5 = vcmp.gt.f32.partialorder %v1138_v53, 0.0 }
 0x293   : > { %v1147_v57 = vpop.f32.mrf.mxu0 }
 0x294   : > { %2716 = vpow2.f32 %v1232_v54  ;;  %v1238_v58 = vmul.f32 1.442695, %v3331_v56  ;;  %v3335_v60 = vadd.f32 %v3326_v48, %v1147_v57  ;;  %vm1219_vm8 = vcmp.gt.f32.partialorder %v3331_v56, 0.0 }
 0x295   : > { %v2457_v61 = vpop.f32.mrf.mxu0 }
 0x296   : > { %2718 = vpow2.f32 %v1238_v58  ;;  %v1236_v62 = vmul.f32 1.442695, %v3335_v60  ;;  %v3339_v0 = vadd.f32 %v2457_v61, %v3326_v48  ;;  %vm1218_vm7 = vcmp.gt.f32.partialorder %v3335_v60, 0.0  ;;  %v3396_v58 = vld [vmem:[%s3756_s9 + $0x20] sm:$0xff] }
 0x297   : > { %v1157_v1 = vpop.f32.mrf.mxu0 }
 0x298   : > { %2720 = vpow2.f32 %v1236_v62  ;;  %v1242_v2 = vmul.f32 1.442695, %v3339_v0  ;;  %v3343_v3 = vadd.f32 %v3326_v48, %v1157_v1  ;;  %vm1221_vm9 = vcmp.gt.f32.partialorder %v3339_v0, 0.0 }
 0x299   : > { %v2460_v5 = vpop.f32.mrf.mxu0 }
 0x29a   : > { %2722 = vpow2.f32 %v1242_v2  ;;  %v1240_v6 = vmul.f32 1.442695, %v3343_v3  ;;  %v3347_v9 = vadd.f32 %v2460_v5, %v3326_v48  ;;  %vm1220_vm10 = vcmp.gt.f32.partialorder %v3343_v3, 0.0 }
 0x29b   : > { %v1167_v10 = vpop.f32.mrf.mxu0 }
 0x29c   : > { %2724 = vpow2.f32 %v1240_v6  ;;  %v1246_v11 = vmul.f32 1.442695, %v3347_v9  ;;  %v3351_v12 = vadd.f32 %v3326_v48, %v1167_v10  ;;  %vm1223_vm12 = vcmp.gt.f32.partialorder %v3347_v9, 0.0 }
 0x29d   : > { %v2463_v13 = vpop.f32.mrf.mxu0 }
 0x29e   : > { %2726 = vpow2.f32 %v1246_v11  ;;  %v1244_v16 = vmul.f32 1.442695, %v3351_v12  ;;  %v3355_v17 = vadd.f32 %v2463_v13, %v3326_v48  ;;  %v3411_v11 = vld [vmem:[%s3756_s9 + $0x18] sm:$0xff]  ;;  %vm1222_vm11 = vcmp.gt.f32.partialorder %v3351_v12, 0.0 }
 0x29f   : > { %v2715_v15 = vpop.eup %2714  ;;  %v1177_v18 = vpop.f32.mrf.mxu0 }
 0x2a0   : > { %v2143_v22 = vadd.f32 -1.0, %v2715_v15  ;;  %2728 = vpow2.f32 %v1244_v16  ;;  %v1250_v23 = vmul.f32 1.442695, %v3355_v17  ;;  %v3359_v25 = vadd.f32 %v3326_v48, %v1177_v18  ;;  %v3425_v18 = vld [vmem:[%s3756_s9 + $0x10] sm:$0xff] }
 0x2a1   : > { %v2717_v21 = vpop.eup %2716  ;;  %v2466_v28 = vpop.f32.mrf.mxu0  ;;  %vm1225_vm14 = vcmp.gt.f32.partialorder %v3355_v17, 0.0 }
 0x2a2   : > { %v2142_v29 = vadd.f32 -1.0, %v2717_v21  ;;  %2730 = vpow2.f32 %v1250_v23  ;;  %v1248_v30 = vmul.f32 1.442695, %v3359_v25  ;;  %v3363_v32 = vadd.f32 %v2466_v28, %v3326_v48 }
 0x2a3   : > { %v2719_v34 = vpop.eup %2718  ;;  %v1187_v35 = vpop.f32.mrf.mxu0  ;;  %v1281_v38 = vsel %vm1217_vm6, %v1143_v50, %v2143_v22  ;;  %vm1224_vm13 = vcmp.gt.f32.partialorder %v3359_v25, 0.0 }
 0x2a4   : > { %v1280_v37 = vsel %vm1216_vm5, %v1138_v53, %v2142_v29  ;;  %2732 = vpow2.f32 %v1248_v30  ;;  %v1254_v39 = vmul.f32 1.442695, %v3363_v32  ;;  %v3367_v40 = vadd.f32 %v3326_v48, %v1187_v35  ;;  %v3436_v30 = vld [vmem:[%s3756_s9 + $0x8] sm:$0xff] }
 0x2a5   : > { %2489 = vmatprep.mubr.msk.f32.mxu1 %vm735_vm3, %v1280_v37  ;;  %v2721_v42 = vpop.eup %2720  ;;  %v2469_v44 = vpop.f32.mrf.mxu0  ;;  %v2145_v50 = vadd.f32 -1.0, %v2719_v34  ;;  %vm1227_vm0 = vcmp.gt.f32.partialorder %v3363_v32, 0.0 }
 0x2a6   : > { %2490 = vmatmul.mubr.msk.f32.vlgmr.msra.gmra.mxu1 %vm735_vm3, %v1281_v38  ;;  %2734 = vpow2.f32 %v1254_v39  ;;  %v1252_v46 = vmul.f32 1.442695, %v3367_v40  ;;  %v3378_v49 = vadd.f32 %v2469_v44, %v3326_v48  ;;  %v2144_v54 = vadd.f32 -1.0, %v2721_v42 }
 0x2a7   : > { %2601 = vmatpush3.msra.mxu1 %v3314_v43  ;;  %v2723_v52 = vpop.eup %2722  ;;  %v1197_v53 = vpop.f32.mrf.mxu0  ;;  %v1283_v10 = vsel %vm1219_vm8, %v3331_v56, %v2145_v50  ;;  %vm1226_vm15 = vcmp.gt.f32.partialorder %v3367_v40, 0.0 }
 0x2a8   : > { %2594 = vmatprep.subr.mxu1 %v3373_v41  ;;  %2736 = vpow2.f32 %v1252_v46  ;;  %v1258_v55 = vmul.f32 1.442695, %v3378_v49  ;;  %v3390_v57 = vadd.f32 %v3326_v48, %v1197_v53  ;;  %v1282_v1 = vsel %vm1218_vm7, %v3335_v60, %v2144_v54 }
 0x2a9   : > { %2602 = vmatpush3.msra.mxu1 %v3373_v41  ;;  %v2725_v61 = vpop.eup %2724  ;;  %v2472_v62 = vpop.f32.mrf.mxu0  ;;  %v2147_v2 = vadd.f32 -1.0, %v2723_v52  ;;  %2492 = vmatprep.mubr.msk.f32.mxu1 %vm735_vm3, %v1282_v1  ;;  %vm1229_vm2 = vcmp.gt.f32.partialorder %v3378_v49, 0.0 }
 0x2aa   : > { %2595 = vmatprep.subr.mxu1 %v3384_v51  ;;  %2738 = vpow2.f32 %v1258_v55  ;;  %v1256_v5 = vmul.f32 1.442695, %v3390_v57  ;;  %v3403_v6 = vadd.f32 %v2472_v62, %v3326_v48  ;;  %2493 = vmatmul.mubr.msk.f32.gmra.mxu1 %vm735_vm3, %v1283_v10  ;;  %v2146_v15 = vadd.f32 -1.0, %v2725_v61 }
 0x2ab   : > { %2603 = vmatpush3.msra.mxu1 %v3384_v51  ;;  %v2727_v60 = vpop.eup %2726  ;;  %v1207_v13 = vpop.f32.mrf.mxu0  ;;  %v1285_v23 = vsel %vm1221_vm9, %v3339_v0, %v2147_v2  ;;  %vm1228_vm1 = vcmp.gt.f32.partialorder %v3390_v57, 0.0 }
 0x2ac   : > { %2596 = vmatprep.subr.mxu1 %v3396_v58  ;;  %2740 = vpow2.f32 %v1256_v5  ;;  %v1262_v56 = vmul.f32 1.442695, %v3403_v6  ;;  %v3419_v16 = vadd.f32 %v3326_v48, %v1207_v13  ;;  %v1284_v22 = vsel %vm1220_vm10, %v3343_v3, %v2146_v15  ;;  %v3446_v3 = vld [vmem:[%s3756_s9] sm:$0xff] }
 0x2ad   : > { %2604 = vmatpush3.msra.mxu1 %v3396_v58  ;;  %v2729_v21 = vpop.eup %2728  ;;  %2495 = vmatprep.mubr.msk.f32.mxu1 %vm735_vm3, %v1284_v22  ;;  %v2149_v29 = vadd.f32 -1.0, %v2727_v60  ;;  %vm1231_vm5 = vcmp.gt.f32.partialorder %v3403_v6, 0.0 }
 0x2ae   : > { %2597 = vmatprep.subr.mxu1 %v3411_v11  ;;  %2742 = vpow2.f32 %v1262_v56  ;;  %v1260_v28 = vmul.f32 1.442695, %v3419_v16  ;;  %v2148_v48 = vadd.f32 -1.0, %v2729_v21  ;;  %2496 = vmatmul.mubr.msk.f32.gmra.mxu1 %vm735_vm3, %v1285_v23  ;;  %vm1230_vm4 = vcmp.gt.f32.partialorder %v3419_v16, 0.0 }
 0x2af   : > { %2605 = vmatpush3.msra.mxu1 %v3411_v11  ;;  %v2731_v34 = vpop.eup %2730  ;;  %v1287_v37 = vsel %vm1223_vm12, %v3347_v9, %v2149_v29 }
 0x2b0   : > { %2598 = vmatprep.subr.mxu1 %v3425_v18  ;;  %2744 = vpow2.f32 %v1260_v28  ;;  %v1286_v0 = vsel %vm1222_vm11, %v3351_v12, %v2148_v48  ;;  %v2151_v39 = vadd.f32 -1.0, %v2731_v34 }
 0x2b1   : > { %2606 = vmatpush3.msra.mxu1 %v3425_v18  ;;  %v2733_v35 = vpop.eup %2732  ;;  %2498 = vmatprep.mubr.msk.f32.mxu1 %vm735_vm3, %v1286_v0 }
 0x2b2   : > { %2599 = vmatprep.subr.mxu1 %v3436_v30  ;;  %v2150_v38 = vadd.f32 -1.0, %v2733_v35  ;;  %2499 = vmatmul.mubr.msk.f32.gmra.mxu1 %vm735_vm3, %v1287_v37  ;;  %v1289_v9 = vsel %vm1225_vm14, %v3355_v17, %v2151_v39 }
 0x2b3   : > { %2607 = vmatpush3.msra.mxu1 %v3436_v30  ;;  %v2735_v12 = vpop.eup %2734 }
 0x2b4   : > { %2600 = vmatprep.subr.mxu1 %v3446_v3  ;;  %v1288_v42 = vsel %vm1224_vm13, %v3359_v25, %v2150_v38  ;;  %v2153_v50 = vadd.f32 -1.0, %v2735_v12 }
 0x2b5   : > { %2608 = vmatpush3.msra.mxu1 %v3446_v3  ;;  %v2737_v44 = vpop.eup %2736  ;;  %2501 = vmatprep.mubr.msk.f32.mxu1 %vm735_vm3, %v1288_v42 }
 0x2b6   : > { %v2152_v46 = vadd.f32 -1.0, %v2737_v44  ;;  %2502 = vmatmul.mubr.msk.f32.gmra.mxu1 %vm735_vm3, %v1289_v9  ;;  %v1291_v25 = vsel %vm1227_vm0, %v3363_v32, %v2153_v50 }
 0x2b7   : > { %v2739_v52 = vpop.eup %2738 }
 0x2b8   : > { %v1290_v53 = vsel %vm1226_vm15, %v3367_v40, %v2152_v46  ;;  %v2155_v61 = vadd.f32 -1.0, %v2739_v52 }
 0x2b9   : > { %v2741_v54 = vpop.eup %2740  ;;  %2504 = vmatprep.mubr.msk.f32.mxu1 %vm735_vm3, %v1290_v53 }
 0x2ba   : > { %v2154_v55 = vadd.f32 -1.0, %v2741_v54  ;;  %2505 = vmatmul.mubr.msk.f32.gmra.mxu1 %vm735_vm3, %v1291_v25  ;;  %v1293_v40 = vsel %vm1229_vm2, %v3378_v49, %v2155_v61 }
 0x2bb   : > { %v2743_v62 = vpop.eup %2742 }
 0x2bc   : > { %v1292_v17 = vsel %vm1228_vm1, %v3390_v57, %v2154_v55  ;;  %v2157_v5 = vadd.f32 -1.0, %v2743_v62 }
 0x2bd   : > { %v2745_v1 = vpop.eup %2744  ;;  %2507 = vmatprep.mubr.msk.f32.mxu1 %vm735_vm3, %v1292_v17 }
 0x2be   : > { %v2156_v2 = vadd.f32 -1.0, %v2745_v1  ;;  %2508 = vmatmul.mubr.msk.f32.gmra.mxu1 %vm735_vm3, %v1293_v40  ;;  %v1295_v57 = vsel %vm1231_vm5, %v3403_v6, %v2157_v5 }
 0x2c0   : > { %v1294_v32 = vsel %vm1230_vm4, %v3419_v16, %v2156_v2 }
 0x2c1   : > { %2510 = vmatprep.mubr.msk.f32.mxu1 %vm735_vm3, %v1294_v32 }
 0x2c2   : > { %2511 = vmatmul.mubr.msk.f32.gmra.mxu1 %vm735_vm3, %v1295_v57 }
 0x2c3   : > { %2572 = vmatprep.mubr.msk.f32.mxu1 %vm735_vm3, %v3208_v59  ;;  %v1596_v59 = vld [vmem:[%s3757_s10 + $0x28] sm:$0xff] }
 0x2c4   : > { %2517 = vmatprep.subr.mxu0 %v1596_v59 }
 0x2c5   : > { %2518 = vmatpush3.msra.mxu0 %v1596_v59 }
 0x2c6   : > { %2573 = vmatmul.mubr.msk.f32.vlgmr.msra.gmra.mxu1 %vm735_vm3, %v3217_v63  ;;  %v1595_v63 = vld [vmem:[%s3757_s10 + $0x20] sm:$0xff] }
 0x2c7   : > { %2575 = vmatprep.mubr.msk.f32.mxu1 %vm735_vm3, %v3226_v7  ;;  %2519 = vmatprep.subr.mxu0 %v1595_v63  ;;  %v1594_v7 = vld [vmem:[%s3757_s10 + $0x18] sm:$0xff] }
 0x2c8   : > { %2520 = vmatpush3.msra.mxu0 %v1595_v63 }
 0x2c9   : > { %2521 = vmatprep.subr.mxu0 %v1594_v7 }
 0x2ca   : > { %2576 = vmatmul.mubr.msk.f32.gmra.mxu1 %vm735_vm3, %v3229_v8  ;;  %2522 = vmatpush3.msra.mxu0 %v1594_v7  ;;  %v1593_v8 = vld [vmem:[%s3757_s10 + $0x10] sm:$0xff] }
 0x2cb   : > { %2578 = vmatprep.mubr.msk.f32.mxu1 %vm735_vm3, %v3237_v4  ;;  %2523 = vmatprep.subr.mxu0 %v1593_v8  ;;  %v1592_v4 = vld [vmem:[%s3757_s10 + $0x8] sm:$0xff] }
 0x2cc   : > { %2524 = vmatpush3.msra.mxu0 %v1593_v8 }
 0x2cd   : > { %2525 = vmatprep.subr.mxu0 %v1592_v4 }
 0x2ce   : > { %2579 = vmatmul.mubr.msk.f32.gmra.mxu1 %vm735_vm3, %v3243_v14  ;;  %2526 = vmatpush3.msra.mxu0 %v1592_v4  ;;  %v1591_v14 = vld [vmem:[%s3757_s10] sm:$0xff] }
 0x2cf   : > { %2581 = vmatprep.mubr.msk.f32.mxu1 %vm735_vm3, %v3250_v19  ;;  %2527 = vmatprep.subr.mxu0 %v1591_v14  ;;  %v3530_v19 = vld [vmem:[%s3755_s8] ss:$0 sm:$0xff] }
 0x2d0   : > { %2528 = vmatpush3.msra.mxu0 %v1591_v14 }
 0x2d1   : > { %2553 = vmatprep.subr.mxu0 %v3314_v43 }
 0x2d2   : > { %2582 = vmatmul.mubr.msk.f32.gmra.mxu1 %vm735_vm3, %v3255_v20 }
 0x2d3   : > { %2584 = vmatprep.mubr.msk.f32.mxu1 %vm735_vm3, %v3261_v24 }
 0x2d6   : > { %2585 = vmatmul.mubr.msk.f32.gmra.mxu1 %vm735_vm3, %v3267_v26 }
 0x2d7   : > { %2587 = vmatprep.mubr.msk.f32.mxu1 %vm735_vm3, %v3273_v31 }
 0x2da   : > { %2588 = vmatmul.mubr.msk.f32.gmra.mxu1 %vm735_vm3, %v3279_v33 }
 0x2db   : > { %2590 = vmatprep.mubr.msk.f32.mxu1 %vm735_vm3, %v3283_v36 }
 0x2de   : > { %2591 = vmatmul.mubr.msk.f32.gmra.mxu1 %vm735_vm3, %v3289_v27 }
 0x366   : > { %v2491_v20 = vpop.f32.mrf.mxu1 }
 0x367   : > { %v1430_v24 = vadd.f32 %v2491_v20, %v3530_v19 }
 0x368   : > { %v1424_v26 = vpop.f32.mrf.mxu1 }
 0x369   : > { %v1521_v31 = vmul.f32 1.442695, %v1430_v24  ;;  %v1425_v33 = vadd.f32 %v3530_v19, %v1424_v26  ;;  %vm1504_vm7 = vcmp.gt.f32.partialorder %v1430_v24, 0.0 }
 0x36a   : > { %v2494_v27 = vpop.f32.mrf.mxu1 }
 0x36b   : > { %2746 = vpow2.f32 %v1521_v31  ;;  %v1519_v36 = vmul.f32 1.442695, %v1425_v33  ;;  %v3535_v49 = vadd.f32 %v2494_v27, %v3530_v19  ;;  %vm1503_vm6 = vcmp.gt.f32.partialorder %v1425_v33, 0.0 }
 0x36c   : > { %v1434_v6 = vpop.f32.mrf.mxu1 }
 0x36d   : > { %2748 = vpow2.f32 %v1519_v36  ;;  %v1525_v10 = vmul.f32 1.442695, %v3535_v49  ;;  %v3539_v60 = vadd.f32 %v3530_v19, %v1434_v6  ;;  %vm1506_vm9 = vcmp.gt.f32.partialorder %v3535_v49, 0.0 }
 0x36e   : > { %v2497_v13 = vpop.f32.mrf.mxu1 }
 0x36f   : > { %2750 = vpow2.f32 %v1525_v10  ;;  %v1523_v15 = vmul.f32 1.442695, %v3539_v60  ;;  %v3543_v56 = vadd.f32 %v2497_v13, %v3530_v19  ;;  %vm1505_vm8 = vcmp.gt.f32.partialorder %v3539_v60, 0.0 }
 0x370   : > { %v1444_v16 = vpop.f32.mrf.mxu1 }
 0x371   : > { %2752 = vpow2.f32 %v1523_v15  ;;  %v1529_v21 = vmul.f32 1.442695, %v3543_v56  ;;  %v3547_v22 = vadd.f32 %v3530_v19, %v1444_v16  ;;  %vm1508_vm10 = vcmp.gt.f32.partialorder %v3543_v56, 0.0 }
 0x372   : > { %v2500_v23 = vpop.f32.mrf.mxu1 }
 0x373   : > { %2754 = vpow2.f32 %v1529_v21  ;;  %v1527_v28 = vmul.f32 1.442695, %v3547_v22  ;;  %v3551_v48 = vadd.f32 %v2500_v23, %v3530_v19  ;;  %vm1507_vm11 = vcmp.gt.f32.partialorder %v3547_v22, 0.0 }
 0x374   : > { %v1454_v29 = vpop.f32.mrf.mxu1 }
 0x375   : > { %2756 = vpow2.f32 %v1527_v28  ;;  %v1533_v34 = vmul.f32 1.442695, %v3551_v48  ;;  %v3555_v0 = vadd.f32 %v3530_v19, %v1454_v29  ;;  %vm1510_vm13 = vcmp.gt.f32.partialorder %v3551_v48, 0.0 }
 0x376   : > { %v2503_v37 = vpop.f32.mrf.mxu1 }
 0x377   : > { %2758 = vpow2.f32 %v1533_v34  ;;  %v1531_v38 = vmul.f32 1.442695, %v3555_v0  ;;  %v3559_v42 = vadd.f32 %v2503_v37, %v3530_v19  ;;  %vm1509_vm12 = vcmp.gt.f32.partialorder %v3555_v0, 0.0 }
 0x378   : > { %v2747_v35 = vpop.eup %2746  ;;  %v1464_v44 = vpop.f32.mrf.mxu1 }
 0x379   : > { %v2176_v12 = vadd.f32 -1.0, %v2747_v35  ;;  %2760 = vpow2.f32 %v1531_v38  ;;  %v3562_v9 = vadd.f32 %v3530_v19, %v1464_v44  ;;  %v1537_v50 = vmul.f32 1.442695, %v3559_v42 }
 0x37a   : > { %v2749_v39 = vpop.eup %2748  ;;  %v2506_v52 = vpop.f32.mrf.mxu1  ;;  %vm1512_vm15 = vcmp.gt.f32.partialorder %v3559_v42, 0.0 }
 0x37b   : > { %v2175_v46 = vadd.f32 -1.0, %v2749_v39  ;;  %v1535_v53 = vmul.f32 1.442695, %v3562_v9  ;;  %v3567_v54 = vadd.f32 %v2506_v52, %v3530_v19  ;;  %v1568_v61 = vsel %vm1504_vm7, %v1430_v24, %v2176_v12 }
 0x37c   : > { %v2751_v55 = vpop.eup %2750  ;;  %2762 = vpow2.f32 %v1537_v50  ;;  %v1474_v62 = vpop.f32.mrf.mxu1  ;;  %vm1511_vm14 = vcmp.gt.f32.partialorder %v3562_v9, 0.0 }
 0x37d   : > { %v1567_v25 = vsel %vm1503_vm6, %v1425_v33, %v2175_v46  ;;  %2764 = vpow2.f32 %v1535_v53  ;;  %v1541_v17 = vmul.f32 1.442695, %v3567_v54  ;;  %v3572_v1 = vadd.f32 %v3530_v19, %v1474_v62 }
 0x37e   : > { %2529 = vmatprep.mubr.msk.f32.mxu0 %vm735_vm3, %v1567_v25  ;;  %v2753_v40 = vpop.eup %2752  ;;  %v2509_v2 = vpop.f32.mrf.mxu1  ;;  %v2178_v57 = vadd.f32 -1.0, %v2751_v55  ;;  %vm1514_vm1 = vcmp.gt.f32.partialorder %v3567_v54, 0.0 }
 0x37f   : > { %2530 = vmatmul.mubr.msk.f32.vlgmr.msra.gmra.mxu0 %vm735_vm3, %v1568_v61  ;;  %2766 = vpow2.f32 %v1541_v17  ;;  %v1539_v5 = vmul.f32 1.442695, %v3572_v1  ;;  %v3578_v32 = vadd.f32 %v2509_v2, %v3530_v19  ;;  %v2177_v7 = vadd.f32 -1.0, %v2753_v40 }
 0x380   : > { %2554 = vmatpush3.msra.mxu0 %v3314_v43  ;;  %v2755_v59 = vpop.eup %2754  ;;  %v1484_v63 = vpop.f32.mrf.mxu1  ;;  %v1570_v31 = vsel %vm1506_vm9, %v3535_v49, %v2178_v57  ;;  %vm1513_vm0 = vcmp.gt.f32.partialorder %v3572_v1, 0.0 }
 0x381   : > { %2555 = vmatprep.subr.mxu0 %v3373_v41  ;;  %2768 = vpow2.f32 %v1539_v5  ;;  %v1545_v8 = vmul.f32 1.442695, %v3578_v32  ;;  %v3585_v43 = vadd.f32 %v3530_v19, %v1484_v63  ;;  %v1569_v20 = vsel %vm1505_vm8, %v3539_v60, %v2177_v7 }
 0x382   : > { %2556 = vmatpush3.msra.mxu0 %v3373_v41  ;;  %v2757_v4 = vpop.eup %2756  ;;  %v2512_v14 = vpop.f32.mrf.mxu1  ;;  %v2180_v24 = vadd.f32 -1.0, %v2755_v59  ;;  %2532 = vmatprep.mubr.msk.f32.mxu0 %vm735_vm3, %v1569_v20  ;;  %vm1516_vm4 = vcmp.gt.f32.partialorder %v3578_v32, 0.0 }
 0x383   : > { %2557 = vmatprep.subr.mxu0 %v3384_v51  ;;  %2770 = vpow2.f32 %v1545_v8  ;;  %v1543_v41 = vmul.f32 1.442695, %v3585_v43  ;;  %v3593_v26 = vadd.f32 %v2512_v14, %v3530_v19  ;;  %2533 = vmatmul.mubr.msk.f32.gmra.mxu0 %vm735_vm3, %v1570_v31  ;;  %v2179_v27 = vadd.f32 -1.0, %v2757_v4 }
 0x384   : > { %2558 = vmatpush3.msra.mxu0 %v3384_v51  ;;  %v2759_v33 = vpop.eup %2758  ;;  %v1494_v36 = vpop.f32.mrf.mxu1  ;;  %v1572_v60 = vsel %vm1508_vm10, %v3543_v56, %v2180_v24  ;;  %vm1515_vm2 = vcmp.gt.f32.partialorder %v3585_v43, 0.0 }
 0x385   : > { %2559 = vmatprep.subr.mxu0 %v3396_v58  ;;  %2772 = vpow2.f32 %v1543_v41  ;;  %v1549_v51 = vmul.f32 1.442695, %v3593_v26  ;;  %v1495_v6 = vadd.f32 %v3530_v19, %v1494_v36  ;;  %v1571_v49 = vsel %vm1507_vm11, %v3547_v22, %v2179_v27 }
 0x386   : > { %2560 = vmatpush3.msra.mxu0 %v3396_v58  ;;  %v2761_v10 = vpop.eup %2760  ;;  %2535 = vmatprep.mubr.msk.f32.mxu0 %vm735_vm3, %v1571_v49  ;;  %v2182_v16 = vadd.f32 -1.0, %v2759_v33  ;;  %vm1518_vm6 = vcmp.gt.f32.partialorder %v3593_v26, 0.0  ;;  %v2574_v53 = vpop.f32.mrf.mxu1 }
 0x387   : > { %2561 = vmatprep.subr.mxu0 %v3411_v11  ;;  %2774 = vpow2.f32 %v1549_v51  ;;  %v1547_v13 = vmul.f32 1.442695, %v1495_v6  ;;  %v2181_v15 = vadd.f32 -1.0, %v2761_v10  ;;  %2536 = vmatmul.mubr.msk.f32.gmra.mxu0 %vm735_vm3, %v1572_v60  ;;  %vm1517_vm5 = vcmp.gt.f32.partialorder %v1495_v6, 0.0 }
 0x388   : > { %2562 = vmatpush3.msra.mxu0 %v3411_v11  ;;  %v1574_v11 = vsel %vm1510_vm13, %v3551_v48, %v2182_v16 }
 0x389   : > { %2563 = vmatprep.subr.mxu0 %v3425_v18  ;;  %v2763_v58 = vpop.eup %2762  ;;  %2776 = vpow2.f32 %v1547_v13  ;;  %v1573_v19 = vsel %vm1509_vm12, %v3555_v0, %v2181_v15 }
 0x38a   : > { %2564 = vmatpush3.msra.mxu0 %v3425_v18  ;;  %v2765_v56 = vpop.eup %2764  ;;  %2538 = vmatprep.mubr.msk.f32.mxu0 %vm735_vm3, %v1573_v19  ;;  %v2184_v22 = vadd.f32 -1.0, %v2763_v58 }
 0x38b   : > { %2565 = vmatprep.subr.mxu0 %v3436_v30  ;;  %v2183_v21 = vadd.f32 -1.0, %v2765_v56  ;;  %2539 = vmatmul.mubr.msk.f32.gmra.mxu0 %vm735_vm3, %v1574_v11 }
 0x38c   : > { %2566 = vmatpush3.msra.mxu0 %v3436_v30  ;;  %v2767_v23 = vpop.eup %2766  ;;  %v1576_v48 = vsel %vm1512_vm15, %v3559_v42, %v2184_v22 }
 0x38d   : > { %2567 = vmatprep.subr.mxu0 %v3446_v3  ;;  %v1575_v18 = vsel %vm1511_vm14, %v3562_v9, %v2183_v21  ;;  %v2186_v30 = vadd.f32 -1.0, %v2767_v23 }
 0x38e   : > { %2568 = vmatpush3.msra.mxu0 %v3446_v3  ;;  %v2769_v28 = vpop.eup %2768  ;;  %2541 = vmatprep.mubr.msk.f32.mxu0 %vm735_vm3, %v1575_v18 }
 0x38f   : > { %v2185_v29 = vadd.f32 -1.0, %v2769_v28  ;;  %2542 = vmatmul.mubr.msk.f32.gmra.mxu0 %vm735_vm3, %v1576_v48  ;;  %v1578_v3 = vsel %vm1514_vm1, %v3567_v54, %v2186_v30  ;;  %v1868_v54 = vpop.f32.mrf.mxu1 }
 0x390   : > { %v2771_v34 = vpop.eup %2770 }
 0x391   : > { %v1577_v0 = vsel %vm1513_vm0, %v3572_v1, %v2185_v29  ;;  %v2188_v38 = vadd.f32 -1.0, %v2771_v34  ;;  %v2577_v25 = vpop.f32.mrf.mxu1 }
 0x392   : > { %v2773_v35 = vpop.eup %2772  ;;  %2544 = vmatprep.mubr.msk.f32.mxu0 %vm735_vm3, %v1577_v0 }
 0x393   : > { %v2187_v37 = vadd.f32 -1.0, %v2773_v35  ;;  %2545 = vmatmul.mubr.msk.f32.gmra.mxu0 %vm735_vm3, %v1578_v3  ;;  %v1580_v44 = vsel %vm1516_vm4, %v3578_v32, %v2188_v38  ;;  %v1878_v55 = vpop.f32.mrf.mxu1 }
 0x394   : > { %v2775_v39 = vpop.eup %2774 }
 0x395   : > { %v1579_v12 = vsel %vm1515_vm2, %v3585_v43, %v2187_v37  ;;  %v2190_v46 = vadd.f32 -1.0, %v2775_v39  ;;  %v2580_v61 = vpop.f32.mrf.mxu1 }
 0x396   : > { %v2777_v42 = vpop.eup %2776  ;;  %2547 = vmatprep.mubr.msk.f32.mxu0 %vm735_vm3, %v1579_v12 }
 0x397   : > { %v2189_v9 = vadd.f32 -1.0, %v2777_v42  ;;  %2548 = vmatmul.mubr.msk.f32.gmra.mxu0 %vm735_vm3, %v1580_v44  ;;  %v1582_v52 = vsel %vm1518_vm6, %v3593_v26, %v2190_v46  ;;  %v1888_v17 = vpop.f32.mrf.mxu1 }
 0x399   : > { %v1581_v50 = vsel %vm1517_vm5, %v1495_v6, %v2189_v9  ;;  %v2583_v40 = vpop.f32.mrf.mxu1 }
 0x39a   : > { %2550 = vmatprep.mubr.msk.f32.mxu0 %vm735_vm3, %v1581_v50 }
 0x39b   : > { %2551 = vmatmul.mubr.msk.f32.gmra.mxu0 %vm735_vm3, %v1582_v52  ;;  %v1898_v5 = vpop.f32.mrf.mxu1 }
 0x39c   : > { %2569 = vmatprep.mubr.msk.f32.mxu0 %vm735_vm3, %v3191_v45  ;;  %v3658_v45 = vld [vmem:[%s3758_s11] ss:$0 sm:$0xff] }
 0x39d   : > { %v2586_v43 = vpop.f32.mrf.mxu1 }
 0x39f   : > { %2570 = vmatmul.mubr.msk.f32.vlgmr.msra.gmra.mxu0 %vm735_vm3, %v3193_v47  ;;  %v1908_v31 = vpop.f32.mrf.mxu1 }
 0x3a1   : > { %v2589_v49 = vpop.f32.mrf.mxu1 }
 0x3a3   : > { %v1918_v56 = vpop.f32.mrf.mxu1 }
 0x3a5   : > { %v2592_v48 = vpop.f32.mrf.mxu1 }
 0x3a7   : > { %v1928_v37 = vpop.f32.mrf.mxu1 }
 0x43f   : > { %v3648_v62 = vpop.f32.mrf.mxu0 }
 0x441   : > { %v3650_v1 = vpop.f32.mrf.mxu0 }
 0x443   : > { %v2534_v47 = vpop.f32.mrf.mxu0 }
 0x444   : > { %v1874_v2 = vadd.f32 %v2574_v53, %v2534_v47 }
 0x445   : > { %v1723_v32 = vpop.f32.mrf.mxu0 }
 0x446   : > { %v1946_v57 = vadd.f32 %v3658_v45, %v1874_v2  ;;  %v1869_v59 = vadd.f32 %v1868_v54, %v1723_v32 }
 0x447   : > { %v2537_v63 = vpop.f32.mrf.mxu0 }
 0x448   : > { %1962 = vst [vmem:[%s3661_s15 + $0x18] sm:$0xff] %v1946_v57  ;;  %v1945_v7 = vadd.f32 %v3658_v45, %v1869_v59  ;;  %v1884_v8 = vadd.f32 %v2577_v25, %v2537_v63 }
 0x449   : > { %v1733_v4 = vpop.f32.mrf.mxu0 }
 0x44a   : > { %1961 = vst [vmem:[%s3661_s15 + $0x10] sm:$0xff] %v1945_v7  ;;  %v1948_v14 = vadd.f32 %v3658_v45, %v1884_v8  ;;  %v1879_v20 = vadd.f32 %v1878_v55, %v1733_v4 }
 0x44b   : > { %v2540_v24 = vpop.f32.mrf.mxu0 }
 0x44c   : > { %1964 = vst [vmem:[%s3661_s15 + $0x28] sm:$0xff] %v1948_v14  ;;  %v1947_v41 = vadd.f32 %v3658_v45, %v1879_v20  ;;  %v1894_v26 = vadd.f32 %v2580_v61, %v2540_v24 }
 0x44d   : > { %v1743_v33 = vpop.f32.mrf.mxu0 }
 0x44e   : > { %1963 = vst [vmem:[%s3661_s15 + $0x20] sm:$0xff] %v1947_v41  ;;  %v1950_v36 = vadd.f32 %v3658_v45, %v1894_v26  ;;  %v1889_v27 = vadd.f32 %v1888_v17, %v1743_v33 }
 0x44f   : > { %v2543_v51 = vpop.f32.mrf.mxu0 }
 0x450   : > { %1966 = vst [vmem:[%s3661_s15 + $0x38] sm:$0xff] %v1950_v36  ;;  %v1949_v6 = vadd.f32 %v3658_v45, %v1889_v27  ;;  %v1904_v10 = vadd.f32 %v2583_v40, %v2543_v51 }
 0x451   : > { %v1753_v60 = vpop.f32.mrf.mxu0 }
 0x452   : > { %1965 = vst [vmem:[%s3661_s15 + $0x30] sm:$0xff] %v1949_v6  ;;  %v1952_v13 = vadd.f32 %v3658_v45, %v1904_v10  ;;  %v1899_v15 = vadd.f32 %v1898_v5, %v1753_v60 }
 0x453   : > { %v2546_v16 = vpop.f32.mrf.mxu0 }
 0x454   : > { %1968 = vst [vmem:[%s3661_s15 + $0x48] sm:$0xff] %v1952_v13  ;;  %v1951_v58 = vadd.f32 %v3658_v45, %v1899_v15  ;;  %v1914_v19 = vadd.f32 %v2586_v43, %v2546_v16 }
 0x455   : > { %v1763_v11 = vpop.f32.mrf.mxu0 }
 0x456   : > { %1967 = vst [vmem:[%s3661_s15 + $0x40] sm:$0xff] %v1951_v58  ;;  %v1954_v21 = vadd.f32 %v3658_v45, %v1914_v19  ;;  %v1909_v22 = vadd.f32 %v1908_v31, %v1763_v11 }
 0x457   : > { %v2549_v23 = vpop.f32.mrf.mxu0 }
 0x458   : > { %1970 = vst [vmem:[%s3661_s15 + $0x58] sm:$0xff] %v1954_v21  ;;  %v1953_v18 = vadd.f32 %v3658_v45, %v1909_v22  ;;  %v1924_v28 = vadd.f32 %v2589_v49, %v2549_v23 }
 0x459   : > { %v1773_v29 = vpop.f32.mrf.mxu0 }
 0x45a   : > { %1969 = vst [vmem:[%s3661_s15 + $0x50] sm:$0xff] %v1953_v18  ;;  %v1956_v30 = vadd.f32 %v3658_v45, %v1924_v28  ;;  %v1919_v34 = vadd.f32 %v1918_v56, %v1773_v29 }
 0x45b   : > { %v2552_v0 = vpop.f32.mrf.mxu0 }
 0x45c   : > { %1972 = vst [vmem:[%s3661_s15 + $0x68] sm:$0xff] %v1956_v30  ;;  %v1955_v35 = vadd.f32 %v3658_v45, %v1919_v34  ;;  %v1934_v3 = vadd.f32 %v2592_v48, %v2552_v0 }
 0x45d   : > { %v1783_v38 = vpop.f32.mrf.mxu0 }
 0x45e   : > { %1971 = vst [vmem:[%s3661_s15 + $0x60] sm:$0xff] %v1955_v35  ;;  %v1958_v39 = vadd.f32 %v3658_v45, %v1934_v3  ;;  %v1929_v12 = vadd.f32 %v1928_v37, %v1783_v38 }
 0x45f   : > { %v2571_v42 = vpop.f32.mrf.mxu0 }
 0x460   : > { %1974 = vst [vmem:[%s3661_s15 + $0x78] sm:$0xff] %v1958_v39  ;;  %v1957_v44 = vadd.f32 %v3658_v45, %v1929_v12  ;;  %v1864_v9 = vadd.f32 %v2571_v42, %v3648_v62 }
 0x461   : > { %v1858_v46 = vpop.f32.mrf.mxu0 }
 0x462   : > { %1973 = vst [vmem:[%s3661_s15 + $0x70] sm:$0xff] %v1957_v44  ;;  %v1944_v50 = vadd.f32 %v3658_v45, %v1864_v9  ;;  %v1859_v52 = vadd.f32 %v1858_v46, %v3650_v1 }
 0x464   : > { %1960 = vst [vmem:[%s3661_s15 + $0x8] sm:$0xff] %v1944_v50  ;;  %v1943_v53 = vadd.f32 %v3658_v45, %v1859_v52 }
 0x466   : > { %1959 = vst [vmem:[%s3661_s15] sm:$0xff] %v1943_v53 }
 0x467   : > { %2791 = shalt.err (!%p2788_p3)
}
 0x468   : > { %s2792_s20 = scalar_lea.hbm %s3698_s26, 2048  ;;  %s2796_s29 = scalar_lea.hbm %s3759_s12, 8192 }
 0x469   : > { %p2793_p4 = scmp.ne.s32.totalorder %s3698_s26, %s2792_s20  ;;  %p2797_p9 = scmp.lt.s32.totalorder %s3698_s26, %s3759_s12 }
 0x46a   : > { %p2798_p10 = scmp.lt.s32.totalorder %s2796_s29, %s2792_s20 }
 0x46b   : > { %p2794_p7 = pnand %p2793_p4, %p2946_p5 }
 0x46c   : > { %p2799_p11 = por %p2798_p10, %p2797_p9 }
 0x46d   : > { %p2795_p8 = pneg %p2794_p7 }
 0x46f   : > { %p2800_p12 = pnand %p2799_p11, %p2795_p8 }
 0x471   : > { %2803 = shalt.err (!%p2800_p12)
}
 0x472   : > { %s2841_s28 = smov 128   ;;  %s2842_s16 = smov 8  }
 0x473   : > { %2609 = dma.vmem_to_hbm [thread:$0]  (%p2946_p5), %s3700_s17, 2048, %s3698_s26, %s3707_s25, %s2841_s28, %s2841_s28, %s2842_s16  }
 0x474 PF: > { %p2615_p13 = scmp.ge.s32.totalorder %s2838_s24, 2  ;;  %s2004_s18 = sand.u32 1, %s2826_s21  }
 0x475   : > { %s2005_s0 = scalar_lea.sflag [#allocation3], %s2004_s18 }
 0x476   : > { %p2612_p0 = pnand %p2615_p13, %p2950_p6 }
 0x478   : > { %p2613_p1 = pneg %p2612_p0 }
 0x47a   : > { %2821 = dma.done.wait (%p2613_p1), %s2005_s0, 2048  }
 0x47b   : > { %2823 = vsyncadd (%p2613_p1), %s2005_s0, 4294965248  ;;  %p22_p2 = scmp.ge.s32.totalorder %s2933_s27, 6   ;;  %s3766_s21 = smov %s2830_s22 }
 0x47c   : > { %s3767_s22 = smov %s2834_s23  ;;  %s3768_s23 = smov %s2944_s30 }
 0x47d   : > { %s3769_s24 = smov %s2933_s27  ;;  %24 = sbr.rel (!%p22_p2) target bundleno = 6 (0x6), region = 103 }
 0x482   :  { %2010 = vsyncpa [#allocation3], 1 }
 0x483   :  { %2012 = vsyncpa [#allocation3 + $0x1], 1 }

</bundles_post_ra>
